<compile_context>
chip_gen: v6e
topology: v6e:2x2x1
jax: 0.10.0
libtpu: 0.0.40
codegen_flags: <defaults>
</compile_context>

<pallas_src>
import functools
import math

import jax
import jax.numpy as jnp
from jax import lax
from jax.experimental import pallas as pl
from jax.experimental.pallas import tpu as pltpu


def lambda_init_fn(depth):
    return 0.8 - 0.6 * math.exp(-0.3 * depth)


def diff_attn_kernel(lam_ref, xq_ref, xk_ref, xv_ref,
                     wq_ref, wk_ref, wv_ref, wo_ref, gamma_ref, o_ref, *,
                     batch, num_heads, head_size, seq_q, seq_kv,
                     lambda_init, eps, causal_mask, compute_dtype,
                     strict_nan_to_num, approx_softmax_recip):
    """Single invocation (no grid): whole batch processed at once.

    xq_ref: (B, T, E)   query tokens (already in compute_dtype)
    xk_ref: (B, N, E)   key tokens
    xv_ref: (B, N, E)   value tokens
    wq_ref/wk_ref: (2H, E, D/2)  per-half-head projection blocks, parity-major
    wv_ref: (H, E, D)            per-head value projection blocks
    wo_ref: (H, D, E)            per-head out-projection blocks (Wo^T row-split)
    gamma_ref: (1, D)            RMSNorm weight (f32)
    lam_ref: SMEM (1,)           scalar lambda_full (f32)
    o_ref:  (B, T, E)            output (f32)
    """
    B, H, D = batch, num_heads, head_size
    DH2 = D // 2
    T, N = seq_q, seq_kv
    E = H * D
    G2 = 2 * H * B          # (parity, head, batch) half-head groups
    G1 = H * B              # (head, batch) groups
    cdt = compute_dtype
    f32 = jnp.float32

    # ---- whole-array loads --------------------------------------------------
    xq = xq_ref[...]                       # (B, T, E)
    xk = xk_ref[...]                       # (B, N, E)
    xv = xv_ref[...]                       # (B, N, E)

    # ---- build head-batched operands: leading-dim broadcast/reshape ONLY ----
    # (no transposes, no lane-dim reshapes, no scratch; stays in vregs)
    # group index along dim 0 is g'*B + b with g' = parity*H + h (parity-major).
    xq_b = jnp.broadcast_to(xq[None], (2 * H, B, T, E)).reshape(G2, T, E)
    xk_b = jnp.broadcast_to(xk[None], (2 * H, B, N, E)).reshape(G2, N, E)
    xv_b = jnp.broadcast_to(xv[None], (H, B, N, E)).reshape(G1, N, E)

    wq_b = jnp.broadcast_to(wq_ref[...][:, None], (2 * H, B, E, DH2)).reshape(G2, E, DH2)
    wk_b = jnp.broadcast_to(wk_ref[...][:, None], (2 * H, B, E, DH2)).reshape(G2, E, DH2)
    wv_b = jnp.broadcast_to(wv_ref[...][:, None], (H, B, E, D)).reshape(G1, E, D)
    wo_b = jnp.broadcast_to(wo_ref[...][:, None], (H, B, D, E)).reshape(G1, D, E)

    # ---- head-batched projections (f32 MXU accumulation) --------------------
    # Identical total FLOPs to dense (rows,E)@(E,E) projections since 2H*DH2==E.
    dn_proj = (((2,), (1,)), ((0,), (0,)))          # (g,m,E) x (g,E,n) -> (g,m,n)
    qh = lax.dot_general(xq_b, wq_b, dn_proj, preferred_element_type=f32)  # (G2,T,DH2)
    kh = lax.dot_general(xk_b, wk_b, dn_proj, preferred_element_type=f32)  # (G2,N,DH2)
    vh = lax.dot_general(xv_b, wv_b, dn_proj, preferred_element_type=f32)  # (G1,N,D)

    # ---- scores for all half-head groups in one batched matmul --------------
    scale = 1.0 / math.sqrt(DH2)
    s = lax.dot_general(qh.astype(cdt), kh.astype(cdt),
                        (((2,), (2,)), ((0,), (0,))),
                        preferred_element_type=f32) * scale               # (G2,T,N)

    if strict_nan_to_num:
        # torch.nan_to_num parity: NaN -> 0, +/-inf -> finfo max/min
        s = jnp.where(jnp.isnan(s), 0.0, s)
        s = jnp.clip(s, jnp.finfo(f32).min, jnp.finfo(f32).max)
    if causal_mask:
        row = lax.broadcasted_iota(jnp.int32, (T, N), 0)
        col = lax.broadcasted_iota(jnp.int32, (T, N), 1)
        s = jnp.where((col <= row)[None, :, :], s, jnp.finfo(f32).min)

    # ---- numerically stable softmax over keys (f32) -------------------------
    s = s - jnp.max(s, axis=-1, keepdims=True)
    ex = jnp.exp(s)
    denom = jnp.sum(ex, axis=-1, keepdims=True)
    if approx_softmax_recip:
        # EUP reciprocal, ~2^-12 relative error (documented deviation).
        p = ex * pl.reciprocal(denom, approx=True)
    else:
        p = ex / denom

    # ---- differential attention: even halves minus lambda * odd halves ------
    lam = lam_ref[0]
    attn = p[:G1] - lam * p[G1:]                                          # (G1,T,N)

    # ---- weighted values, batched over (head, batch) ------------------------
    # NOTE: for tighter bf16 parity keep compute_dtype=float32 (attn is small
    # and signed; casting it to bf16 is the source of the looser tolerance).
    o3 = lax.dot_general(attn.astype(cdt), vh.astype(cdt),
                         (((2,), (1,)), ((0,), (0,))),
                         preferred_element_type=f32)                      # (G1,T,D)

    # ---- RMSNorm over head dim + (1 - lambda_init) rescale (f32) -------------
    ms = jnp.mean(o3 * o3, axis=-1, keepdims=True)
    o3 = o3 * lax.rsqrt(ms + eps) * gamma_ref[...]
    o3 = o3 * (1.0 - lambda_init)

    # ---- out-projection: per-head matmul then sum over heads -----------------
    # (replaces head-concat scratch + store/reload; same FLOPs as (BT,E)@(E,E))
    oproj = lax.dot_general(o3.astype(cdt), wo_b,
                            (((2,), (1,)), ((0,), (0,))),
                            preferred_element_type=f32)                   # (G1,T,E)
    out = oproj.reshape(H, B, T, E).sum(axis=0)                           # (B,T,E)
    o_ref[...] = out.astype(o_ref.dtype)


def diff_mha_forward(query, key, value, wq, wk, wv, wo, gamma,
                     lq1, lq2, lk1, lk2, lambda_init, num_heads,
                     mask=False, compute_dtype=jnp.float32,
                     strict_nan_to_num=True, approx_softmax_recip=True):
    """query: (B,T,E); key/value: (B,N,E); wq/wk/wv/wo: (E,E) PyTorch-style
    (out,in) Linear weights (bias=False); gamma: (D,) RMSNorm weight.
    compute_dtype=jnp.bfloat16 is recommended on v6e/v7x (softmax/norm stay f32,
    exact-parity path is compute_dtype=float32)."""
    B, T, E = query.shape
    N = key.shape[1]
    H = num_heads
    D = E // H
    DH2 = D // 2

    # lambda_full = exp(sum(lq1*lk1)) - exp(sum(lq2*lk2)) + lambda_init
    lam_full = (jnp.exp(jnp.sum(lq1 * lk1)) - jnp.exp(jnp.sum(lq2 * lk2))
                + jnp.float32(lambda_init)).reshape((1,)).astype(jnp.float32)

    # Head-blocked, pre-transposed weights (one-time wrapper-side XLA work).
    # Half-head group index g' = parity*H + h (parity-major), so the kernel's
    # differential step is a plain leading-halves slice.
    wq_h = wq.T.reshape(E, H, 2, DH2).transpose(2, 1, 0, 3).reshape(2 * H, E, DH2)
    wk_h = wk.T.reshape(E, H, 2, DH2).transpose(2, 1, 0, 3).reshape(2 * H, E, DH2)
    wv_h = wv.T.reshape(E, H, D).transpose(1, 0, 2)            # (H, E, D)
    wo_h = wo.T.reshape(H, D, E)                               # (H, D, E)

    # compute_dtype cast happens HERE (wrapper) so bf16 halves input DMA bytes
    # and the kernel does no per-invocation VPU converts of its inputs.
    q_in = query.astype(compute_dtype)
    k_in = key.astype(compute_dtype)
    v_in = value.astype(compute_dtype)
    wq_h = wq_h.astype(compute_dtype)
    wk_h = wk_h.astype(compute_dtype)
    wv_h = wv_h.astype(compute_dtype)
    wo_h = wo_h.astype(compute_dtype)
    gamma2 = gamma.reshape(1, D).astype(jnp.float32)

    kernel = functools.partial(
        diff_attn_kernel,
        batch=B, num_heads=H, head_size=D, seq_q=T, seq_kv=N,
        lambda_init=float(lambda_init), eps=1e-5, causal_mask=mask,
        compute_dtype=compute_dtype, strict_nan_to_num=strict_nan_to_num,
        approx_softmax_recip=approx_softmax_recip)

    vmem = pl.BlockSpec(memory_space=pltpu.MemorySpace.VMEM)
    return pl.pallas_call(
        kernel,
        out_shape=jax.ShapeDtypeStruct((B, T, E), jnp.float32),
        # No grid: whole batch in one invocation (v5e/v6e single-TC optimum at
        # these sizes; see TODO above for v7x multi-TC split at large shapes).
        in_specs=[
            pl.BlockSpec(memory_space=pltpu.MemorySpace.SMEM),   # lambda_full
            vmem,                                                # query
            vmem,                                                # key
            vmem,                                                # value
            vmem,                                                # Wq blocks
            vmem,                                                # Wk blocks
            vmem,                                                # Wv blocks
            vmem,                                                # Wo blocks
            vmem,                                                # rmsnorm gamma
        ],
        out_specs=vmem,
    )(lam_full, q_in, k_in, v_in, wq_h, wk_h, wv_h, wo_h, gamma2)


def reference_forward(query, key, value, wq, wk, wv, wo, gamma,
                      lq1, lq2, lk1, lk2, lambda_init, num_heads, mask=False):
    """Pure-JAX transcription of the PyTorch forward (eval mode)."""
    B, T, E = query.shape
    N = key.shape[1]
    H = num_heads
    D = E // H
    DH2 = D // 2
    q = query @ wq.T
    k = key @ wk.T
    v = value @ wv.T
    lam_full = jnp.exp(jnp.sum(lq1 * lk1)) - jnp.exp(jnp.sum(lq2 * lk2)) + lambda_init
    q = q.reshape(B, T, 2 * H, DH2).transpose(0, 2, 1, 3)
    k = k.reshape(B, N, 2 * H, DH2).transpose(0, 2, 1, 3)
    v = v.reshape(B, N, H, D).transpose(0, 2, 1, 3)
    att = jnp.einsum('bhtd,bhnd->bhtn', q, k) / math.sqrt(DH2)
    att = jnp.nan_to_num(att)
    if mask:
        row = jnp.arange(T)[:, None]
        col = jnp.arange(N)[None, :]
        att = jnp.where((col <= row)[None, None], att, jnp.finfo(att.dtype).min)
    att = jax.nn.softmax(att, axis=-1)
    att = att.reshape(B, H, 2, T, N)
    attn = att[:, :, 0] - lam_full * att[:, :, 1]
    out = jnp.einsum('bhtn,bhnd->bhtd', attn, v)
    ms = jnp.mean(out * out, axis=-1, keepdims=True)
    out = out * jax.lax.rsqrt(ms + 1e-5) * gamma
    out = out * (1.0 - lambda_init)
    out = out.transpose(0, 2, 1, 3).reshape(B, T, E)
    return out @ wo.T


if __name__ == "__main__":
    # Module config: attn_size=32, diff_num_heads=4, depth=2, bias=False,
    # dropout in eval mode (identity).
    B, T, N, E, H = 2, 8, 8, 32, 4
    D = E // H
    DH2 = D // 2
    depth = 2
    lambda_init = lambda_init_fn(depth)

    rng = jax.random.PRNGKey(0)
    keys = jax.random.split(rng, 11)
    query = jax.random.normal(keys[0], (B, T, E), jnp.float32)
    key_in = jax.random.normal(keys[1], (B, N, E), jnp.float32)
    value = jax.random.normal(keys[2], (B, N, E), jnp.float32)
    wq = jax.random.normal(keys[3], (E, E), jnp.float32) * 0.1
    wk = jax.random.normal(keys[4], (E, E), jnp.float32) * 0.1
    wv = jax.random.normal(keys[5], (E, E), jnp.float32) * 0.1
    wo = jax.random.normal(keys[6], (E, E), jnp.float32) * 0.1
    lq1 = jax.random.normal(keys[7], (DH2,), jnp.float32) * 0.1
    lq2 = jax.random.normal(keys[8], (DH2,), jnp.float32) * 0.1
    lk1 = jax.random.normal(keys[9], (DH2,), jnp.float32) * 0.1
    lk2 = jax.random.normal(keys[10], (DH2,), jnp.float32) * 0.1
    gamma = jnp.ones((D,), jnp.float32)   # RMSNorm elementwise_affine init

    # --- f32 path, no mask ---------------------------------------------------
    out = diff_mha_forward(query, key_in, value, wq, wk, wv, wo, gamma,
                           lq1, lq2, lk1, lk2, lambda_init, H, mask=False)
    out = jax.block_until_ready(out)
    ref = reference_forward(query, key_in, value, wq, wk, wv, wo, gamma,
                            lq1, lq2, lk1, lk2, lambda_init, H, mask=False)
    assert out.shape == (B, T, E) and out.dtype == jnp.float32
    assert jnp.allclose(out, ref, atol=5e-3, rtol=5e-3), (
        f"f32 max abs err {float(jnp.max(jnp.abs(out - ref)))}")

    # --- causal-mask path (T == N so the tril mask is well defined) ----------
    out_m = diff_mha_forward(query, key_in, value, wq, wk, wv, wo, gamma,
                             lq1, lq2, lk1, lk2, lambda_init, H, mask=True)
    out_m = jax.block_until_ready(out_m)
    ref_m = reference_forward(query, key_in, value, wq, wk, wv, wo, gamma,
                              lq1, lq2, lk1, lk2, lambda_init, H, mask=True)
    assert jnp.allclose(out_m, ref_m, atol=5e-3, rtol=5e-3), (
        f"masked max abs err {float(jnp.max(jnp.abs(out_m - ref_m)))}")

    # --- exact-softmax path (approx reciprocal gated off) ---------------------
    out_x = diff_mha_forward(query, key_in, value, wq, wk, wv, wo, gamma,
                             lq1, lq2, lk1, lk2, lambda_init, H, mask=False,
                             approx_softmax_recip=False)
    out_x = jax.block_until_ready(out_x)
    assert jnp.allclose(out_x, ref, atol=5e-3, rtol=5e-3), (
        f"exact-recip max abs err {float(jnp.max(jnp.abs(out_x - ref)))}")

    # --- bf16 MXU path (recommended on v6e/v7x); softmax/norm stay in f32 ----
    out_bf = diff_mha_forward(query, key_in, value, wq, wk, wv, wo, gamma,
                              lq1, lq2, lk1, lk2, lambda_init, H, mask=False,
                              compute_dtype=jnp.bfloat16)
    out_bf = jax.block_until_ready(out_bf)
    assert jnp.allclose(out_bf, ref, atol=3e-2, rtol=3e-2), (
        f"bf16 max abs err {float(jnp.max(jnp.abs(out_bf - ref)))}")

    print("KERNEL_OK")
</pallas_src>

<mosaic_0001>
module attributes {stable_mosaic.version = 11 : i64} {
  func.func @diff_attn_kernel(%arg0: memref<1xf32, #tpu.memory_space<smem>>, %arg1: memref<2x8x32xf32, #tpu.memory_space<vmem>>, %arg2: memref<2x8x32xf32, #tpu.memory_space<vmem>>, %arg3: memref<2x8x32xf32, #tpu.memory_space<vmem>>, %arg4: memref<8x32x4xf32, #tpu.memory_space<vmem>>, %arg5: memref<8x32x4xf32, #tpu.memory_space<vmem>>, %arg6: memref<4x32x8xf32, #tpu.memory_space<vmem>>, %arg7: memref<4x8x32xf32, #tpu.memory_space<vmem>>, %arg8: memref<1x8xf32, #tpu.memory_space<vmem>>, %arg9: memref<2x8x32xf32, #tpu.memory_space<vmem>>) attributes {dimension_semantics = [], scalar_prefetch = 0 : i64, scratch_operands = 0 : i64, tpu.core_type = #tpu.core_type<tc>} {
    %c0 = arith.constant 0 : index
    %c0_0 = arith.constant 0 : index
    %c0_1 = arith.constant 0 : index
    %0 = vector.load %arg1[%c0, %c0_0, %c0_1] : memref<2x8x32xf32, #tpu.memory_space<vmem>>, vector<2x8x32xf32>
    %c0_2 = arith.constant 0 : index
    %c0_3 = arith.constant 0 : index
    %c0_4 = arith.constant 0 : index
    %1 = vector.load %arg2[%c0_2, %c0_3, %c0_4] : memref<2x8x32xf32, #tpu.memory_space<vmem>>, vector<2x8x32xf32>
    %c0_5 = arith.constant 0 : index
    %c0_6 = arith.constant 0 : index
    %c0_7 = arith.constant 0 : index
    %2 = vector.load %arg3[%c0_5, %c0_6, %c0_7] : memref<2x8x32xf32, #tpu.memory_space<vmem>>, vector<2x8x32xf32>
    %3 = vector.shape_cast %0 : vector<2x8x32xf32> to vector<1x2x8x32xf32>
    %4 = vector.shape_cast %3 : vector<1x2x8x32xf32> to vector<1x2x8x32xf32>
    %5 = vector.broadcast %4 : vector<1x2x8x32xf32> to vector<8x2x8x32xf32>
    %6 = vector.shape_cast %5 : vector<8x2x8x32xf32> to vector<16x8x32xf32>
    %7 = vector.shape_cast %1 : vector<2x8x32xf32> to vector<1x2x8x32xf32>
    %8 = vector.shape_cast %7 : vector<1x2x8x32xf32> to vector<1x2x8x32xf32>
    %9 = vector.broadcast %8 : vector<1x2x8x32xf32> to vector<8x2x8x32xf32>
    %10 = vector.shape_cast %9 : vector<8x2x8x32xf32> to vector<16x8x32xf32>
    %11 = vector.shape_cast %2 : vector<2x8x32xf32> to vector<1x2x8x32xf32>
    %12 = vector.shape_cast %11 : vector<1x2x8x32xf32> to vector<1x2x8x32xf32>
    %13 = vector.broadcast %12 : vector<1x2x8x32xf32> to vector<4x2x8x32xf32>
    %14 = vector.shape_cast %13 : vector<4x2x8x32xf32> to vector<8x8x32xf32>
    %c0_8 = arith.constant 0 : index
    %c0_9 = arith.constant 0 : index
    %c0_10 = arith.constant 0 : index
    %15 = vector.load %arg4[%c0_8, %c0_9, %c0_10] : memref<8x32x4xf32, #tpu.memory_space<vmem>>, vector<8x32x4xf32>
    %16 = vector.shape_cast %15 : vector<8x32x4xf32> to vector<8x1x32x4xf32>
    %17 = vector.shape_cast %16 : vector<8x1x32x4xf32> to vector<8x1x32x4xf32>
    %18 = vector.broadcast %17 : vector<8x1x32x4xf32> to vector<8x2x32x4xf32>
    %19 = vector.shape_cast %18 : vector<8x2x32x4xf32> to vector<16x32x4xf32>
    %c0_11 = arith.constant 0 : index
    %c0_12 = arith.constant 0 : index
    %c0_13 = arith.constant 0 : index
    %20 = vector.load %arg5[%c0_11, %c0_12, %c0_13] : memref<8x32x4xf32, #tpu.memory_space<vmem>>, vector<8x32x4xf32>
    %21 = vector.shape_cast %20 : vector<8x32x4xf32> to vector<8x1x32x4xf32>
    %22 = vector.shape_cast %21 : vector<8x1x32x4xf32> to vector<8x1x32x4xf32>
    %23 = vector.broadcast %22 : vector<8x1x32x4xf32> to vector<8x2x32x4xf32>
    %24 = vector.shape_cast %23 : vector<8x2x32x4xf32> to vector<16x32x4xf32>
    %c0_14 = arith.constant 0 : index
    %c0_15 = arith.constant 0 : index
    %c0_16 = arith.constant 0 : index
    %25 = vector.load %arg6[%c0_14, %c0_15, %c0_16] : memref<4x32x8xf32, #tpu.memory_space<vmem>>, vector<4x32x8xf32>
    %26 = vector.shape_cast %25 : vector<4x32x8xf32> to vector<4x1x32x8xf32>
    %27 = vector.shape_cast %26 : vector<4x1x32x8xf32> to vector<4x1x32x8xf32>
    %28 = vector.broadcast %27 : vector<4x1x32x8xf32> to vector<4x2x32x8xf32>
    %29 = vector.shape_cast %28 : vector<4x2x32x8xf32> to vector<8x32x8xf32>
    %c0_17 = arith.constant 0 : index
    %c0_18 = arith.constant 0 : index
    %c0_19 = arith.constant 0 : index
    %30 = vector.load %arg7[%c0_17, %c0_18, %c0_19] : memref<4x8x32xf32, #tpu.memory_space<vmem>>, vector<4x8x32xf32>
    %31 = vector.shape_cast %30 : vector<4x8x32xf32> to vector<4x1x8x32xf32>
    %32 = vector.shape_cast %31 : vector<4x1x8x32xf32> to vector<4x1x8x32xf32>
    %33 = vector.broadcast %32 : vector<4x1x8x32xf32> to vector<4x2x8x32xf32>
    %34 = vector.shape_cast %33 : vector<4x2x8x32xf32> to vector<8x8x32xf32>
    %cst = arith.constant dense<0.000000e+00> : vector<16x8x4xf32>
    %35 = tpu.matmul %6, %19, %cst {dimension_numbers = #tpu.dot_dimension_numbers<[2], [1], [1], [2], [0, 0, 0, 1, 1, 2], [0], [0]>} : vector<16x8x32xf32>, vector<16x32x4xf32>, vector<16x8x4xf32> -> vector<16x8x4xf32>
    %cst_20 = arith.constant dense<0.000000e+00> : vector<16x8x4xf32>
    %36 = tpu.matmul %10, %24, %cst_20 {dimension_numbers = #tpu.dot_dimension_numbers<[2], [1], [1], [2], [0, 0, 0, 1, 1, 2], [0], [0]>} : vector<16x8x32xf32>, vector<16x32x4xf32>, vector<16x8x4xf32> -> vector<16x8x4xf32>
    %cst_21 = arith.constant dense<0.000000e+00> : vector<8x8x8xf32>
    %37 = tpu.matmul %14, %29, %cst_21 {dimension_numbers = #tpu.dot_dimension_numbers<[2], [1], [1], [2], [0, 0, 0, 1, 1, 2], [0], [0]>} : vector<8x8x32xf32>, vector<8x32x8xf32>, vector<8x8x8xf32> -> vector<8x8x8xf32>
    %cst_22 = arith.constant dense<0.000000e+00> : vector<16x8x8xf32>
    %38 = tpu.matmul %35, %36, %cst_22 {dimension_numbers = #tpu.dot_dimension_numbers<[2], [2], [1], [1], [0, 0, 0, 1, 1, 1], [0], [0]>} : vector<16x8x4xf32>, vector<16x8x4xf32>, vector<16x8x8xf32> -> vector<16x8x8xf32>
    %cst_23 = arith.constant 5.000000e-01 : f32
    %39 = vector.broadcast %cst_23 : f32 to vector<16x8x8xf32>
    %40 = arith.mulf %38, %39 : vector<16x8x8xf32>
    %41 = arith.cmpf one, %40, %40 : vector<16x8x8xf32>
    %cst_24 = arith.constant 0.000000e+00 : f32
    %42 = vector.broadcast %cst_24 : f32 to vector<16x8x8xf32>
    %43 = arith.select %41, %42, %40 : vector<16x8x8xi1>, vector<16x8x8xf32>
    %cst_25 = arith.constant -3.40282347E+38 : f32
    %cst_26 = arith.constant 3.40282347E+38 : f32
    %44 = vector.broadcast %cst_25 : f32 to vector<16x8x8xf32>
    %45 = arith.maximumf %44, %43 : vector<16x8x8xf32>
    %46 = vector.broadcast %cst_26 : f32 to vector<16x8x8xf32>
    %47 = arith.minimumf %46, %45 : vector<16x8x8xf32>
    %cst_27 = arith.constant dense<0xFF800000> : vector<16x8xf32>
    %48 = vector.multi_reduction <maximumf>, %47, %cst_27 [2] : vector<16x8x8xf32> to vector<16x8xf32>
    %49 = vector.shape_cast %48 : vector<16x8xf32> to vector<16x8x1xf32>
    %50 = vector.broadcast %49 : vector<16x8x1xf32> to vector<16x8x8xf32>
    %51 = arith.subf %47, %50 : vector<16x8x8xf32>
    %52 = math.exp %51 : vector<16x8x8xf32>
    %cst_28 = arith.constant dense<0.000000e+00> : vector<16x8xf32>
    %53 = vector.multi_reduction <add>, %52, %cst_28 [2] : vector<16x8x8xf32> to vector<16x8xf32>
    %54 = vector.shape_cast %53 : vector<16x8xf32> to vector<16x8x1xf32>
    %55 = tpu.reciprocal %54 {approx = true} : vector<16x8x1xf32> -> vector<16x8x1xf32>
    %56 = vector.broadcast %55 : vector<16x8x1xf32> to vector<16x8x8xf32>
    %57 = arith.mulf %52, %56 : vector<16x8x8xf32>
    %c0_29 = arith.constant 0 : index
    %58 = memref.load %arg0[%c0_29] : memref<1xf32, #tpu.memory_space<smem>>
    %59 = vector.extract_strided_slice %57 {offsets = [0, 0, 0], sizes = [8, 8, 8], strides = [1, 1, 1]} : vector<16x8x8xf32> to vector<8x8x8xf32>
    %60 = vector.extract_strided_slice %57 {offsets = [8, 0, 0], sizes = [8, 8, 8], strides = [1, 1, 1]} : vector<16x8x8xf32> to vector<8x8x8xf32>
    %61 = vector.broadcast %58 : f32 to vector<8x8x8xf32>
    %62 = arith.mulf %61, %60 : vector<8x8x8xf32>
    %63 = arith.subf %59, %62 : vector<8x8x8xf32>
    %cst_30 = arith.constant dense<0.000000e+00> : vector<8x8x8xf32>
    %64 = tpu.matmul %63, %37, %cst_30 {dimension_numbers = #tpu.dot_dimension_numbers<[2], [1], [1], [2], [0, 0, 0, 1, 1, 2], [0], [0]>} : vector<8x8x8xf32>, vector<8x8x8xf32>, vector<8x8x8xf32> -> vector<8x8x8xf32>
    %65 = arith.mulf %64, %64 : vector<8x8x8xf32>
    %cst_31 = arith.constant dense<0.000000e+00> : vector<8x8xf32>
    %66 = vector.multi_reduction <add>, %65, %cst_31 [2] : vector<8x8x8xf32> to vector<8x8xf32>
    %67 = vector.shape_cast %66 : vector<8x8xf32> to vector<8x8x1xf32>
    %cst_32 = arith.constant 8.000000e+00 : f32
    %68 = vector.broadcast %cst_32 : f32 to vector<8x8x1xf32>
    %69 = arith.divf %67, %68 : vector<8x8x1xf32>
    %cst_33 = arith.constant 9.99999974E-6 : f32
    %70 = vector.broadcast %cst_33 : f32 to vector<8x8x1xf32>
    %71 = arith.addf %69, %70 : vector<8x8x1xf32>
    %72 = math.rsqrt %71 : vector<8x8x1xf32>
    %73 = vector.broadcast %72 : vector<8x8x1xf32> to vector<8x8x8xf32>
    %74 = arith.mulf %64, %73 : vector<8x8x8xf32>
    %c0_34 = arith.constant 0 : index
    %c0_35 = arith.constant 0 : index
    %75 = vector.load %arg8[%c0_34, %c0_35] : memref<1x8xf32, #tpu.memory_space<vmem>>, vector<1x8xf32>
    %76 = vector.shape_cast %75 : vector<1x8xf32> to vector<1x1x8xf32>
    %77 = vector.broadcast %76 : vector<1x1x8xf32> to vector<8x8x8xf32>
    %78 = arith.mulf %74, %77 : vector<8x8x8xf32>
    %cst_36 = arith.constant 5.292870e-01 : f32
    %79 = vector.broadcast %cst_36 : f32 to vector<8x8x8xf32>
    %80 = arith.mulf %78, %79 : vector<8x8x8xf32>
    %cst_37 = arith.constant dense<0.000000e+00> : vector<8x8x32xf32>
    %81 = tpu.matmul %80, %34, %cst_37 {dimension_numbers = #tpu.dot_dimension_numbers<[2], [1], [1], [2], [0, 0, 0, 1, 1, 2], [0], [0]>} : vector<8x8x8xf32>, vector<8x8x32xf32>, vector<8x8x32xf32> -> vector<8x8x32xf32>
    %82 = vector.shape_cast %81 : vector<8x8x32xf32> to vector<4x2x8x32xf32>
    %cst_38 = arith.constant dense<0.000000e+00> : vector<2x8x32xf32>
    %83 = vector.multi_reduction <add>, %82, %cst_38 [0] : vector<4x2x8x32xf32> to vector<2x8x32xf32>
    %c0_39 = arith.constant 0 : index
    %c0_40 = arith.constant 0 : index
    %c0_41 = arith.constant 0 : index
    %84 = vector.load %arg9[%c0_39, %c0_40, %c0_41] : memref<2x8x32xf32, #tpu.memory_space<vmem>>, vector<2x8x32xf32>
    tpu.vector_store %arg9[%c0_39, %c0_40, %c0_41], %83 {strides = array<i32>} : memref<2x8x32xf32, #tpu.memory_space<vmem>>, vector<2x8x32xf32>,
    return
  }
}

</mosaic_0001>

<bundles_post_ra>
// kernel: tpu_custom_call.1
= control target key start
LH: loop header
LB: loop body
LE: loop exit
PB: predicated region body
PF: predicated region fallthrough
CT: control target
= control target key end

     0   :  { %v6799_v1 = vmov 0.0   ;;  %vm124_vm0 = vcmask 261120   ;;  %vm6800_vm1 = vmmov 0   ;;  %s7943_s0 = inlined_call_operand.<no memory space> [shape: f32[1], index: 0, kind: input, shape index: {}]   ;;  %s7944_s1 = inlined_call_operand.vmem [shape: f32[2,8,32], index: 1, kind: input, shape index: {}]   ;;  %s7945_s2 = inlined_call_operand.vmem [shape: f32[2,8,32], index: 2, kind: input, shape index: {}]   ;;  %s7946_s3 = inlined_call_operand.vmem [shape: f32[2,8,32], index: 3, kind: input, shape index: {}]   ;;  %s7947_s4 = inlined_call_operand.vmem [shape: f32[8,32,4], index: 4, kind: input, shape index: {}]   ;;  %s7948_s5 = inlined_call_operand.vmem [shape: f32[8,32,4], index: 5, kind: input, shape index: {}]   ;;  %s7949_s6 = inlined_call_operand.vmem [shape: f32[4,32,8], index: 6, kind: input, shape index: {}]   ;;  %s7950_s7 = inlined_call_operand.vmem [shape: f32[4,8,32], index: 7, kind: input, shape index: {}]   ;;  %s7951_s8 = inlined_call_operand.vmem [shape: f32[1,8], index: 8, kind: input, shape index: {}]   ;;  %s7952_s9 = inlined_call_operand.hbm [shape: f32[2,8,32], index: 9, kind: output, shape index: {}]  }
   0x1   :  { %v43_v0 = vld [vmem:[%s7947_s4 + $0x18] sm:$0xff]  ;;  %6092 = vmatprep.subr.mxu0 %v6799_v1  ;;  %6103 = vmatprep.subr.mxu1 %v6799_v1  ;;  %v42_v2 = vld [vmem:[%s7947_s4 + $0x10] sm:$0xff]  ;;  %v41_v3 = vld [vmem:[%s7947_s4 + $0x8] sm:$0xff] }
   0x2   :  { %6093 = vmatpush3.msra.mxu0 %v43_v0  ;;  %6104 = vmatpush3.msra.mxu1 %v43_v0  ;;  %v40_v4 = vld [vmem:[%s7947_s4] sm:$0xff]  ;;  %v6882_v6 = vld [vmem:[%s7944_s1 + $0x8] sm:$0xff]  ;;  %v47_v7 = vld [vmem:[%s7947_s4 + $0x38] sm:$0xff] }
   0x3   :  { %6094 = vmatprep.subr.mxu0 %v6799_v1  ;;  %6105 = vmatprep.subr.mxu1 %v6799_v1  ;;  %v6877_v5 = vld [vmem:[%s7944_s1] sm:$0xff]  ;;  %v46_v8 = vld [vmem:[%s7947_s4 + $0x30] sm:$0xff]  ;;  %v45_v9 = vld [vmem:[%s7947_s4 + $0x28] sm:$0xff] }
   0x4   :  { %6095 = vmatpush3.msra.mxu0 %v42_v2  ;;  %6106 = vmatpush3.msra.mxu1 %v42_v2  ;;  %v44_v10 = vld [vmem:[%s7947_s4 + $0x20] sm:$0xff]  ;;  %v51_v11 = vld [vmem:[%s7947_s4 + $0x58] sm:$0xff]  ;;  %v50_v12 = vld [vmem:[%s7947_s4 + $0x50] sm:$0xff] }
   0x5   :  { %6096 = vmatprep.subr.mxu0 %v6799_v1  ;;  %6107 = vmatprep.subr.mxu1 %v6799_v1 }
   0x6   :  { %6097 = vmatpush3.msra.mxu0 %v41_v3  ;;  %6108 = vmatpush3.msra.mxu1 %v41_v3 }
   0x7   :  { %6098 = vmatprep.subr.mxu0 %v6799_v1  ;;  %6109 = vmatprep.subr.mxu1 %v6799_v1 }
   0x8   :  { %6099 = vmatpush3.msra.mxu0 %v40_v4  ;;  %6100 = vmatprep.mubr.msk.f32.mxu0 %vm6800_vm1, %v6799_v1 }
   0x9   :  { %6110 = vmatpush3.msra.mxu1 %v40_v4  ;;  %6111 = vmatprep.mubr.msk.f32.mxu1 %vm6800_vm1, %v6799_v1 }
   0xa   :  { %6101 = vmatmul.mubr.msk.f32.vlgmr.msra.gmra.mxu0 %vm124_vm0, %v6877_v5  ;;  %6112 = vmatmul.mubr.msk.f32.vlgmr.msra.gmra.mxu1 %vm124_vm0, %v6882_v6 }
   0xb   :  { %6114 = vmatprep.subr.mxu0 %v6799_v1  ;;  %6125 = vmatprep.subr.mxu1 %v6799_v1 }
   0xc   :  { %6115 = vmatpush3.msra.mxu0 %v47_v7  ;;  %6126 = vmatpush3.msra.mxu1 %v47_v7 }
   0xd   :  { %6116 = vmatprep.subr.mxu0 %v6799_v1  ;;  %6127 = vmatprep.subr.mxu1 %v6799_v1 }
   0xe   :  { %6117 = vmatpush3.msra.mxu0 %v46_v8  ;;  %6128 = vmatpush3.msra.mxu1 %v46_v8 }
   0xf   :  { %6118 = vmatprep.subr.mxu0 %v6799_v1  ;;  %6129 = vmatprep.subr.mxu1 %v6799_v1 }
  0x10   :  { %6119 = vmatpush3.msra.mxu0 %v45_v9  ;;  %6130 = vmatpush3.msra.mxu1 %v45_v9 }
  0x11   :  { %6120 = vmatprep.subr.mxu0 %v6799_v1  ;;  %6131 = vmatprep.subr.mxu1 %v6799_v1 }
  0x12   :  { %6121 = vmatpush3.msra.mxu0 %v44_v10  ;;  %6122 = vmatprep.mubr.msk.f32.mxu0 %vm6800_vm1, %v6799_v1 }
  0x13   :  { %6132 = vmatpush3.msra.mxu1 %v44_v10  ;;  %6133 = vmatprep.mubr.msk.f32.mxu1 %vm6800_vm1, %v6799_v1 }
  0x14   :  { %6123 = vmatmul.mubr.msk.f32.vlgmr.msra.gmra.mxu0 %vm124_vm0, %v6877_v5  ;;  %6134 = vmatmul.mubr.msk.f32.vlgmr.msra.gmra.mxu1 %vm124_vm0, %v6882_v6 }
  0x15   :  { %6136 = vmatprep.subr.mxu0 %v6799_v1  ;;  %6147 = vmatprep.subr.mxu1 %v6799_v1 }
  0x16   :  { %15 = vsyncpa [#allocation4], 0  ;;  %6137 = vmatpush3.msra.mxu0 %v51_v11  ;;  %6148 = vmatpush3.msra.mxu1 %v51_v11  ;;  %v49_v13 = vld [vmem:[%s7947_s4 + $0x48] sm:$0xff]  ;;  %v48_v14 = vld [vmem:[%s7947_s4 + $0x40] sm:$0xff]  ;;  %vm2943_vm2 = vcmask 31744   ;;  %vm4240_vm5 = vcmask 64512  }
  0x17   :  { %6138 = vmatprep.subr.mxu0 %v6799_v1  ;;  %6149 = vmatprep.subr.mxu1 %v6799_v1  ;;  %v55_v15 = vld [vmem:[%s7947_s4 + $0x78] sm:$0xff]  ;;  %v54_v16 = vld [vmem:[%s7947_s4 + $0x70] sm:$0xff]  ;;  %v53_v17 = vld [vmem:[%s7947_s4 + $0x68] sm:$0xff] }
  0x18   :  { %6139 = vmatpush3.msra.mxu0 %v50_v12  ;;  %6150 = vmatpush3.msra.mxu1 %v50_v12  ;;  %v52_v18 = vld [vmem:[%s7947_s4 + $0x60] sm:$0xff]  ;;  %v59_v19 = vld [vmem:[%s7947_s4 + $0x98] sm:$0xff]  ;;  %v58_v20 = vld [vmem:[%s7947_s4 + $0x90] sm:$0xff] }
  0x19   :  { %6140 = vmatprep.subr.mxu0 %v6799_v1  ;;  %6151 = vmatprep.subr.mxu1 %v6799_v1  ;;  %v57_v21 = vld [vmem:[%s7947_s4 + $0x88] sm:$0xff]  ;;  %v56_v22 = vld [vmem:[%s7947_s4 + $0x80] sm:$0xff]  ;;  %v63_v23 = vld [vmem:[%s7947_s4 + $0xb8] sm:$0xff] }
  0x1a   :  { %6141 = vmatpush3.msra.mxu0 %v49_v13  ;;  %6152 = vmatpush3.msra.mxu1 %v49_v13  ;;  %v62_v24 = vld [vmem:[%s7947_s4 + $0xb0] sm:$0xff]  ;;  %v61_v25 = vld [vmem:[%s7947_s4 + $0xa8] sm:$0xff]  ;;  %v60_v26 = vld [vmem:[%s7947_s4 + $0xa0] sm:$0xff] }
  0x1b   :  { %6142 = vmatprep.subr.mxu0 %v6799_v1  ;;  %6153 = vmatprep.subr.mxu1 %v6799_v1  ;;  %v67_v27 = vld [vmem:[%s7947_s4 + $0xd8] sm:$0xff]  ;;  %v66_v28 = vld [vmem:[%s7947_s4 + $0xd0] sm:$0xff]  ;;  %v65_v29 = vld [vmem:[%s7947_s4 + $0xc8] sm:$0xff] }
  0x1c   :  { %6143 = vmatpush3.msra.mxu0 %v48_v14  ;;  %6144 = vmatprep.mubr.msk.f32.mxu0 %vm6800_vm1, %v6799_v1  ;;  %v64_v30 = vld [vmem:[%s7947_s4 + $0xc0] sm:$0xff]  ;;  %v71_v31 = vld [vmem:[%s7947_s4 + $0xf8] sm:$0xff]  ;;  %v70_v32 = vld [vmem:[%s7947_s4 + $0xf0] sm:$0xff] }
  0x1d   :  { %6154 = vmatpush3.msra.mxu1 %v48_v14  ;;  %6155 = vmatprep.mubr.msk.f32.mxu1 %vm6800_vm1, %v6799_v1  ;;  %v69_v33 = vld [vmem:[%s7947_s4 + $0xe8] sm:$0xff]  ;;  %v68_v34 = vld [vmem:[%s7947_s4 + $0xe0] sm:$0xff]  ;;  %v75_v35 = vld [vmem:[%s7948_s5 + $0x18] sm:$0xff] }
  0x1e   :  { %6145 = vmatmul.mubr.msk.f32.vlgmr.msra.gmra.mxu0 %vm124_vm0, %v6877_v5  ;;  %6156 = vmatmul.mubr.msk.f32.vlgmr.msra.gmra.mxu1 %vm124_vm0, %v6882_v6  ;;  %v74_v36 = vld [vmem:[%s7948_s5 + $0x10] sm:$0xff]  ;;  %v73_v37 = vld [vmem:[%s7948_s5 + $0x8] sm:$0xff]  ;;  %v72_v38 = vld [vmem:[%s7948_s5] sm:$0xff] }
  0x1f   :  { %6158 = vmatprep.subr.mxu0 %v6799_v1  ;;  %6169 = vmatprep.subr.mxu1 %v6799_v1  ;;  %v7111_v39 = vld [vmem:[%s7945_s2] sm:$0xff]  ;;  %v7116_v40 = vld [vmem:[%s7945_s2 + $0x8] sm:$0xff]  ;;  %v79_v41 = vld [vmem:[%s7948_s5 + $0x38] sm:$0xff] }
  0x20   :  { %6159 = vmatpush3.msra.mxu0 %v55_v15  ;;  %6170 = vmatpush3.msra.mxu1 %v55_v15  ;;  %v78_v42 = vld [vmem:[%s7948_s5 + $0x30] sm:$0xff]  ;;  %v77_v43 = vld [vmem:[%s7948_s5 + $0x28] sm:$0xff]  ;;  %v76_v44 = vld [vmem:[%s7948_s5 + $0x20] sm:$0xff] }
  0x21   :  { %6160 = vmatprep.subr.mxu0 %v6799_v1  ;;  %6171 = vmatprep.subr.mxu1 %v6799_v1  ;;  %v83_v45 = vld [vmem:[%s7948_s5 + $0x58] sm:$0xff]  ;;  %v82_v46 = vld [vmem:[%s7948_s5 + $0x50] sm:$0xff]  ;;  %v81_v47 = vld [vmem:[%s7948_s5 + $0x48] sm:$0xff] }
  0x22   :  { %6161 = vmatpush3.msra.mxu0 %v54_v16  ;;  %6172 = vmatpush3.msra.mxu1 %v54_v16  ;;  %v80_v48 = vld [vmem:[%s7948_s5 + $0x40] sm:$0xff]  ;;  %v87_v49 = vld [vmem:[%s7948_s5 + $0x78] sm:$0xff]  ;;  %v86_v50 = vld [vmem:[%s7948_s5 + $0x70] sm:$0xff] }
  0x23   :  { %6162 = vmatprep.subr.mxu0 %v6799_v1  ;;  %6173 = vmatprep.subr.mxu1 %v6799_v1  ;;  %v85_v51 = vld [vmem:[%s7948_s5 + $0x68] sm:$0xff]  ;;  %v84_v52 = vld [vmem:[%s7948_s5 + $0x60] sm:$0xff]  ;;  %v91_v53 = vld [vmem:[%s7948_s5 + $0x98] sm:$0xff] }
  0x24   :  { %6163 = vmatpush3.msra.mxu0 %v53_v17  ;;  %6174 = vmatpush3.msra.mxu1 %v53_v17  ;;  %v90_v54 = vld [vmem:[%s7948_s5 + $0x90] sm:$0xff]  ;;  %v89_v55 = vld [vmem:[%s7948_s5 + $0x88] sm:$0xff]  ;;  %v88_v56 = vld [vmem:[%s7948_s5 + $0x80] sm:$0xff] }
  0x25   :  { %6164 = vmatprep.subr.mxu0 %v6799_v1  ;;  %6175 = vmatprep.subr.mxu1 %v6799_v1  ;;  %v95_v57 = vld [vmem:[%s7948_s5 + $0xb8] sm:$0xff]  ;;  %v94_v58 = vld [vmem:[%s7948_s5 + $0xb0] sm:$0xff]  ;;  %v93_v59 = vld [vmem:[%s7948_s5 + $0xa8] sm:$0xff] }
  0x26   :  { %6165 = vmatpush3.msra.mxu0 %v52_v18  ;;  %6166 = vmatprep.mubr.msk.f32.mxu0 %vm6800_vm1, %v6799_v1  ;;  %v92_v60 = vld [vmem:[%s7948_s5 + $0xa0] sm:$0xff]  ;;  %v99_v61 = vld [vmem:[%s7948_s5 + $0xd8] sm:$0xff]  ;;  %v98_v62 = vld [vmem:[%s7948_s5 + $0xd0] sm:$0xff] }
  0x27   :  { %6176 = vmatpush3.msra.mxu1 %v52_v18  ;;  %6177 = vmatprep.mubr.msk.f32.mxu1 %vm6800_vm1, %v6799_v1  ;;  %v97_v63 = vld [vmem:[%s7948_s5 + $0xc8] sm:$0xff]  ;;  %v96_v0 = vld [vmem:[%s7948_s5 + $0xc0] sm:$0xff]  ;;  %v103_v2 = vld [vmem:[%s7948_s5 + $0xf8] sm:$0xff] }
  0x28   :  { %6167 = vmatmul.mubr.msk.f32.vlgmr.msra.gmra.mxu0 %vm124_vm0, %v6877_v5  ;;  %6178 = vmatmul.mubr.msk.f32.vlgmr.msra.gmra.mxu1 %vm124_vm0, %v6882_v6  ;;  %v102_v3 = vld [vmem:[%s7948_s5 + $0xf0] sm:$0xff]  ;;  %v101_v4 = vld [vmem:[%s7948_s5 + $0xe8] sm:$0xff]  ;;  %v104_v9 = vld [vmem:[%s7949_s6] sm:$0xff] }
  0x29   :  { %6180 = vmatprep.subr.mxu0 %v6799_v1  ;;  %6191 = vmatprep.subr.mxu1 %v6799_v1  ;;  %v106_v7 = vld [vmem:[%s7949_s6 + $0x10] sm:$0xff]  ;;  %v105_v8 = vld [vmem:[%s7949_s6 + $0x8] sm:$0xff]  ;;  %v7345_v10 = vld [vmem:[%s7946_s3] sm:$0xff] }
  0x2a   :  { %6181 = vmatpush3.msra.mxu0 %v59_v19  ;;  %6192 = vmatpush3.msra.mxu1 %v59_v19  ;;  %v7350_v11 = vld [vmem:[%s7946_s3 + $0x8] sm:$0xff]  ;;  %v111_v12 = vld [vmem:[%s7949_s6 + $0x38] sm:$0xff]  ;;  %v110_v13 = vld [vmem:[%s7949_s6 + $0x30] sm:$0xff] }
  0x2b   :  { %6182 = vmatprep.subr.mxu0 %v6799_v1  ;;  %6193 = vmatprep.subr.mxu1 %v6799_v1  ;;  %v109_v14 = vld [vmem:[%s7949_s6 + $0x28] sm:$0xff]  ;;  %v108_v15 = vld [vmem:[%s7949_s6 + $0x20] sm:$0xff]  ;;  %v115_v16 = vld [vmem:[%s7949_s6 + $0x58] sm:$0xff] }
  0x2c   :  { %6183 = vmatpush3.msra.mxu0 %v58_v20  ;;  %6194 = vmatpush3.msra.mxu1 %v58_v20  ;;  %v114_v17 = vld [vmem:[%s7949_s6 + $0x50] sm:$0xff]  ;;  %v113_v18 = vld [vmem:[%s7949_s6 + $0x48] sm:$0xff]  ;;  %v112_v19 = vld [vmem:[%s7949_s6 + $0x40] sm:$0xff] }
  0x2d   :  { %6184 = vmatprep.subr.mxu0 %v6799_v1  ;;  %6195 = vmatprep.subr.mxu1 %v6799_v1  ;;  %v119_v20 = vld [vmem:[%s7949_s6 + $0x78] sm:$0xff] }
  0x2e   :  { %6185 = vmatpush3.msra.mxu0 %v57_v21  ;;  %6196 = vmatpush3.msra.mxu1 %v57_v21  ;;  %v118_v21 = vld [vmem:[%s7949_s6 + $0x70] sm:$0xff] }
  0x2f   :  { %6186 = vmatprep.subr.mxu0 %v6799_v1  ;;  %6197 = vmatprep.subr.mxu1 %v6799_v1 }
  0x30   :  { %6187 = vmatpush3.msra.mxu0 %v56_v22  ;;  %6188 = vmatprep.mubr.msk.f32.mxu0 %vm6800_vm1, %v6799_v1 }
  0x31   :  { %6198 = vmatpush3.msra.mxu1 %v56_v22  ;;  %6199 = vmatprep.mubr.msk.f32.mxu1 %vm6800_vm1, %v6799_v1  ;;  %v117_v22 = vld [vmem:[%s7949_s6 + $0x68] sm:$0xff] }
  0x32   :  { %6189 = vmatmul.mubr.msk.f32.vlgmr.msra.gmra.mxu0 %vm124_vm0, %v6877_v5  ;;  %6200 = vmatmul.mubr.msk.f32.vlgmr.msra.gmra.mxu1 %vm124_vm0, %v6882_v6 }
  0x33   :  { %6202 = vmatprep.subr.mxu0 %v6799_v1  ;;  %6213 = vmatprep.subr.mxu1 %v6799_v1 }
  0x34   :  { %6203 = vmatpush3.msra.mxu0 %v63_v23  ;;  %6214 = vmatpush3.msra.mxu1 %v63_v23  ;;  %v116_v23 = vld [vmem:[%s7949_s6 + $0x60] sm:$0xff] }
  0x35   :  { %6204 = vmatprep.subr.mxu0 %v6799_v1  ;;  %6215 = vmatprep.subr.mxu1 %v6799_v1 }
  0x36   :  { %6205 = vmatpush3.msra.mxu0 %v62_v24  ;;  %6216 = vmatpush3.msra.mxu1 %v62_v24 }
  0x37   :  { %6206 = vmatprep.subr.mxu0 %v6799_v1  ;;  %6217 = vmatprep.subr.mxu1 %v6799_v1 }
  0x38   :  { %6207 = vmatpush3.msra.mxu0 %v61_v25  ;;  %6218 = vmatpush3.msra.mxu1 %v61_v25 }
  0x39   :  { %6208 = vmatprep.subr.mxu0 %v6799_v1  ;;  %6219 = vmatprep.subr.mxu1 %v6799_v1 }
  0x3a   :  { %6209 = vmatpush3.msra.mxu0 %v60_v26  ;;  %6210 = vmatprep.mubr.msk.f32.mxu0 %vm6800_vm1, %v6799_v1 }
  0x3b   :  { %6220 = vmatpush3.msra.mxu1 %v60_v26  ;;  %6221 = vmatprep.mubr.msk.f32.mxu1 %vm6800_vm1, %v6799_v1 }
  0x3c   :  { %6211 = vmatmul.mubr.msk.f32.vlgmr.msra.gmra.mxu0 %vm124_vm0, %v6877_v5  ;;  %6222 = vmatmul.mubr.msk.f32.vlgmr.msra.gmra.mxu1 %vm124_vm0, %v6882_v6 }
  0x3d   :  { %6224 = vmatprep.subr.mxu0 %v6799_v1  ;;  %6235 = vmatprep.subr.mxu1 %v6799_v1 }
  0x3e   :  { %6225 = vmatpush3.msra.mxu0 %v67_v27  ;;  %6236 = vmatpush3.msra.mxu1 %v67_v27 }
  0x3f   :  { %6226 = vmatprep.subr.mxu0 %v6799_v1  ;;  %6237 = vmatprep.subr.mxu1 %v6799_v1 }
  0x40   :  { %6227 = vmatpush3.msra.mxu0 %v66_v28  ;;  %6238 = vmatpush3.msra.mxu1 %v66_v28 }
  0x41   :  { %6228 = vmatprep.subr.mxu0 %v6799_v1  ;;  %6239 = vmatprep.subr.mxu1 %v6799_v1 }
  0x42   :  { %6229 = vmatpush3.msra.mxu0 %v65_v29  ;;  %6240 = vmatpush3.msra.mxu1 %v65_v29 }
  0x43   :  { %6230 = vmatprep.subr.mxu0 %v6799_v1  ;;  %6241 = vmatprep.subr.mxu1 %v6799_v1 }
  0x44   :  { %6231 = vmatpush3.msra.mxu0 %v64_v30  ;;  %6232 = vmatprep.mubr.msk.f32.mxu0 %vm6800_vm1, %v6799_v1 }
  0x45   :  { %6242 = vmatpush3.msra.mxu1 %v64_v30  ;;  %6243 = vmatprep.mubr.msk.f32.mxu1 %vm6800_vm1, %v6799_v1 }
  0x46   :  { %6233 = vmatmul.mubr.msk.f32.vlgmr.msra.gmra.mxu0 %vm124_vm0, %v6877_v5  ;;  %6244 = vmatmul.mubr.msk.f32.vlgmr.msra.gmra.mxu1 %vm124_vm0, %v6882_v6 }
  0x47   :  { %6246 = vmatprep.subr.mxu0 %v6799_v1  ;;  %6257 = vmatprep.subr.mxu1 %v6799_v1 }
  0x48   :  { %6247 = vmatpush3.msra.mxu0 %v71_v31  ;;  %6258 = vmatpush3.msra.mxu1 %v71_v31 }
  0x49   :  { %6248 = vmatprep.subr.mxu0 %v6799_v1  ;;  %6259 = vmatprep.subr.mxu1 %v6799_v1 }
  0x4a   :  { %6249 = vmatpush3.msra.mxu0 %v70_v32  ;;  %6260 = vmatpush3.msra.mxu1 %v70_v32 }
  0x4b   :  { %6250 = vmatprep.subr.mxu0 %v6799_v1  ;;  %6261 = vmatprep.subr.mxu1 %v6799_v1 }
  0x4c   :  { %6251 = vmatpush3.msra.mxu0 %v69_v33  ;;  %6262 = vmatpush3.msra.mxu1 %v69_v33 }
  0x4d   :  { %6252 = vmatprep.subr.mxu0 %v6799_v1  ;;  %6263 = vmatprep.subr.mxu1 %v6799_v1 }
  0x4e   :  { %6253 = vmatpush3.msra.mxu0 %v68_v34  ;;  %6254 = vmatprep.mubr.msk.f32.mxu0 %vm6800_vm1, %v6799_v1 }
  0x4f   :  { %6264 = vmatpush3.msra.mxu1 %v68_v34  ;;  %6265 = vmatprep.mubr.msk.f32.mxu1 %vm6800_vm1, %v6799_v1 }
  0x50   :  { %6255 = vmatmul.mubr.msk.f32.vlgmr.msra.gmra.mxu0 %vm124_vm0, %v6877_v5  ;;  %6266 = vmatmul.mubr.msk.f32.vlgmr.msra.gmra.mxu1 %vm124_vm0, %v6882_v6  ;;  %v100_v5 = vld [vmem:[%s7948_s5 + $0xe0] sm:$0xff]  ;;  %v107_v6 = vld [vmem:[%s7949_s6 + $0x18] sm:$0xff] }
  0x51   :  { %6268 = vmatprep.subr.mxu0 %v6799_v1  ;;  %6279 = vmatprep.subr.mxu1 %v6799_v1 }
  0x52   :  { %6269 = vmatpush3.msra.mxu0 %v75_v35  ;;  %6280 = vmatpush3.msra.mxu1 %v75_v35 }
  0x53   :  { %6270 = vmatprep.subr.mxu0 %v6799_v1  ;;  %6281 = vmatprep.subr.mxu1 %v6799_v1 }
  0x54   :  { %6271 = vmatpush3.msra.mxu0 %v74_v36  ;;  %6282 = vmatpush3.msra.mxu1 %v74_v36 }
  0x55   :  { %6272 = vmatprep.subr.mxu0 %v6799_v1  ;;  %6283 = vmatprep.subr.mxu1 %v6799_v1 }
  0x56   :  { %6273 = vmatpush3.msra.mxu0 %v73_v37  ;;  %6284 = vmatpush3.msra.mxu1 %v73_v37 }
  0x57   :  { %6274 = vmatprep.subr.mxu0 %v6799_v1  ;;  %6285 = vmatprep.subr.mxu1 %v6799_v1 }
  0x58   :  { %6275 = vmatpush3.msra.mxu0 %v72_v38  ;;  %6276 = vmatprep.mubr.msk.f32.mxu0 %vm6800_vm1, %v6799_v1 }
  0x59   :  { %6286 = vmatpush3.msra.mxu1 %v72_v38  ;;  %6287 = vmatprep.mubr.msk.f32.mxu1 %vm6800_vm1, %v6799_v1 }
  0x5a   :  { %6277 = vmatmul.mubr.msk.f32.vlgmr.msra.gmra.mxu0 %vm124_vm0, %v7111_v39  ;;  %6288 = vmatmul.mubr.msk.f32.vlgmr.msra.gmra.mxu1 %vm124_vm0, %v7116_v40 }
  0x5b   :  { %6290 = vmatprep.subr.mxu0 %v6799_v1  ;;  %6301 = vmatprep.subr.mxu1 %v6799_v1 }
  0x5c   :  { %6291 = vmatpush3.msra.mxu0 %v79_v41  ;;  %6302 = vmatpush3.msra.mxu1 %v79_v41 }
  0x5d   :  { %6292 = vmatprep.subr.mxu0 %v6799_v1  ;;  %6303 = vmatprep.subr.mxu1 %v6799_v1 }
  0x5e   :  { %6293 = vmatpush3.msra.mxu0 %v78_v42  ;;  %6304 = vmatpush3.msra.mxu1 %v78_v42 }
  0x5f   :  { %6294 = vmatprep.subr.mxu0 %v6799_v1  ;;  %6305 = vmatprep.subr.mxu1 %v6799_v1 }
  0x60   :  { %6295 = vmatpush3.msra.mxu0 %v77_v43  ;;  %6306 = vmatpush3.msra.mxu1 %v77_v43 }
  0x61   :  { %6296 = vmatprep.subr.mxu0 %v6799_v1  ;;  %6307 = vmatprep.subr.mxu1 %v6799_v1 }
  0x62   :  { %6297 = vmatpush3.msra.mxu0 %v76_v44  ;;  %6298 = vmatprep.mubr.msk.f32.mxu0 %vm6800_vm1, %v6799_v1 }
  0x63   :  { %6308 = vmatpush3.msra.mxu1 %v76_v44  ;;  %6309 = vmatprep.mubr.msk.f32.mxu1 %vm6800_vm1, %v6799_v1 }
  0x64   :  { %6299 = vmatmul.mubr.msk.f32.vlgmr.msra.gmra.mxu0 %vm124_vm0, %v7111_v39  ;;  %6310 = vmatmul.mubr.msk.f32.vlgmr.msra.gmra.mxu1 %vm124_vm0, %v7116_v40 }
  0x65   :  { %6312 = vmatprep.subr.mxu0 %v6799_v1  ;;  %6323 = vmatprep.subr.mxu1 %v6799_v1 }
  0x66   :  { %6313 = vmatpush3.msra.mxu0 %v83_v45  ;;  %6324 = vmatpush3.msra.mxu1 %v83_v45 }
  0x67   :  { %6314 = vmatprep.subr.mxu0 %v6799_v1  ;;  %6325 = vmatprep.subr.mxu1 %v6799_v1 }
  0x68   :  { %6315 = vmatpush3.msra.mxu0 %v82_v46  ;;  %6326 = vmatpush3.msra.mxu1 %v82_v46 }
  0x69   :  { %6316 = vmatprep.subr.mxu0 %v6799_v1  ;;  %6327 = vmatprep.subr.mxu1 %v6799_v1 }
  0x6a   :  { %6317 = vmatpush3.msra.mxu0 %v81_v47  ;;  %6328 = vmatpush3.msra.mxu1 %v81_v47 }
  0x6b   :  { %6318 = vmatprep.subr.mxu0 %v6799_v1  ;;  %6329 = vmatprep.subr.mxu1 %v6799_v1 }
  0x6c   :  { %6319 = vmatpush3.msra.mxu0 %v80_v48  ;;  %6320 = vmatprep.mubr.msk.f32.mxu0 %vm6800_vm1, %v6799_v1 }
  0x6d   :  { %6330 = vmatpush3.msra.mxu1 %v80_v48  ;;  %6331 = vmatprep.mubr.msk.f32.mxu1 %vm6800_vm1, %v6799_v1 }
  0x6e   :  { %6321 = vmatmul.mubr.msk.f32.vlgmr.msra.gmra.mxu0 %vm124_vm0, %v7111_v39  ;;  %6332 = vmatmul.mubr.msk.f32.vlgmr.msra.gmra.mxu1 %vm124_vm0, %v7116_v40 }
  0x6f   :  { %6334 = vmatprep.subr.mxu0 %v6799_v1  ;;  %6345 = vmatprep.subr.mxu1 %v6799_v1 }
  0x70   :  { %6335 = vmatpush3.msra.mxu0 %v87_v49  ;;  %6346 = vmatpush3.msra.mxu1 %v87_v49 }
  0x71   :  { %6336 = vmatprep.subr.mxu0 %v6799_v1  ;;  %6347 = vmatprep.subr.mxu1 %v6799_v1 }
  0x72   :  { %6337 = vmatpush3.msra.mxu0 %v86_v50  ;;  %6348 = vmatpush3.msra.mxu1 %v86_v50 }
  0x73   :  { %6338 = vmatprep.subr.mxu0 %v6799_v1  ;;  %6349 = vmatprep.subr.mxu1 %v6799_v1 }
  0x74   :  { %6339 = vmatpush3.msra.mxu0 %v85_v51  ;;  %6350 = vmatpush3.msra.mxu1 %v85_v51 }
  0x75   :  { %6340 = vmatprep.subr.mxu0 %v6799_v1  ;;  %6351 = vmatprep.subr.mxu1 %v6799_v1 }
  0x76   :  { %6341 = vmatpush3.msra.mxu0 %v84_v52  ;;  %6342 = vmatprep.mubr.msk.f32.mxu0 %vm6800_vm1, %v6799_v1 }
  0x77   :  { %6352 = vmatpush3.msra.mxu1 %v84_v52  ;;  %6353 = vmatprep.mubr.msk.f32.mxu1 %vm6800_vm1, %v6799_v1 }
  0x78   :  { %6343 = vmatmul.mubr.msk.f32.vlgmr.msra.gmra.mxu0 %vm124_vm0, %v7111_v39  ;;  %6354 = vmatmul.mubr.msk.f32.vlgmr.msra.gmra.mxu1 %vm124_vm0, %v7116_v40 }
  0x79   :  { %6356 = vmatprep.subr.mxu0 %v6799_v1  ;;  %6367 = vmatprep.subr.mxu1 %v6799_v1 }
  0x7a   :  { %6357 = vmatpush3.msra.mxu0 %v91_v53  ;;  %6368 = vmatpush3.msra.mxu1 %v91_v53 }
  0x7b   :  { %6358 = vmatprep.subr.mxu0 %v6799_v1  ;;  %6369 = vmatprep.subr.mxu1 %v6799_v1 }
  0x7c   :  { %6359 = vmatpush3.msra.mxu0 %v90_v54  ;;  %6370 = vmatpush3.msra.mxu1 %v90_v54 }
  0x7d   :  { %6360 = vmatprep.subr.mxu0 %v6799_v1  ;;  %6371 = vmatprep.subr.mxu1 %v6799_v1 }
  0x7e   :  { %6361 = vmatpush3.msra.mxu0 %v89_v55  ;;  %6372 = vmatpush3.msra.mxu1 %v89_v55 }
  0x7f   :  { %6362 = vmatprep.subr.mxu0 %v6799_v1  ;;  %6373 = vmatprep.subr.mxu1 %v6799_v1 }
  0x80   :  { %6363 = vmatpush3.msra.mxu0 %v88_v56  ;;  %6364 = vmatprep.mubr.msk.f32.mxu0 %vm6800_vm1, %v6799_v1 }
  0x81   :  { %6374 = vmatpush3.msra.mxu1 %v88_v56  ;;  %6375 = vmatprep.mubr.msk.f32.mxu1 %vm6800_vm1, %v6799_v1 }
  0x82   :  { %6365 = vmatmul.mubr.msk.f32.vlgmr.msra.gmra.mxu0 %vm124_vm0, %v7111_v39  ;;  %6376 = vmatmul.mubr.msk.f32.vlgmr.msra.gmra.mxu1 %vm124_vm0, %v7116_v40 }
  0x83   :  { %6378 = vmatprep.subr.mxu0 %v6799_v1  ;;  %6389 = vmatprep.subr.mxu1 %v6799_v1 }
  0x84   :  { %6379 = vmatpush3.msra.mxu0 %v95_v57  ;;  %6390 = vmatpush3.msra.mxu1 %v95_v57 }
  0x85   :  { %6380 = vmatprep.subr.mxu0 %v6799_v1  ;;  %6391 = vmatprep.subr.mxu1 %v6799_v1 }
  0x86   :  { %6381 = vmatpush3.msra.mxu0 %v94_v58  ;;  %6392 = vmatpush3.msra.mxu1 %v94_v58 }
  0x87   :  { %6382 = vmatprep.subr.mxu0 %v6799_v1  ;;  %6393 = vmatprep.subr.mxu1 %v6799_v1 }
  0x88   :  { %6383 = vmatpush3.msra.mxu0 %v93_v59  ;;  %6394 = vmatpush3.msra.mxu1 %v93_v59 }
  0x89   :  { %6384 = vmatprep.subr.mxu0 %v6799_v1  ;;  %6395 = vmatprep.subr.mxu1 %v6799_v1 }
  0x8a   :  { %6385 = vmatpush3.msra.mxu0 %v92_v60  ;;  %6386 = vmatprep.mubr.msk.f32.mxu0 %vm6800_vm1, %v6799_v1 }
  0x8b   :  { %6396 = vmatpush3.msra.mxu1 %v92_v60  ;;  %6397 = vmatprep.mubr.msk.f32.mxu1 %vm6800_vm1, %v6799_v1 }
  0x8c   :  { %6387 = vmatmul.mubr.msk.f32.vlgmr.msra.gmra.mxu0 %vm124_vm0, %v7111_v39  ;;  %6398 = vmatmul.mubr.msk.f32.vlgmr.msra.gmra.mxu1 %vm124_vm0, %v7116_v40 }
  0x8d   :  { %6400 = vmatprep.subr.mxu0 %v6799_v1  ;;  %6411 = vmatprep.subr.mxu1 %v6799_v1 }
  0x8e   :  { %6401 = vmatpush3.msra.mxu0 %v99_v61  ;;  %6412 = vmatpush3.msra.mxu1 %v99_v61 }
  0x8f   :  { %6402 = vmatprep.subr.mxu0 %v6799_v1  ;;  %6413 = vmatprep.subr.mxu1 %v6799_v1 }
  0x90   :  { %6403 = vmatpush3.msra.mxu0 %v98_v62  ;;  %6414 = vmatpush3.msra.mxu1 %v98_v62 }
  0x91   :  { %6404 = vmatprep.subr.mxu0 %v6799_v1  ;;  %6415 = vmatprep.subr.mxu1 %v6799_v1 }
  0x92   :  { %6405 = vmatpush3.msra.mxu0 %v97_v63  ;;  %6416 = vmatpush3.msra.mxu1 %v97_v63 }
  0x93   :  { %6406 = vmatprep.subr.mxu0 %v6799_v1  ;;  %6417 = vmatprep.subr.mxu1 %v6799_v1 }
  0x94   :  { %6407 = vmatpush3.msra.mxu0 %v96_v0  ;;  %6408 = vmatprep.mubr.msk.f32.mxu0 %vm6800_vm1, %v6799_v1 }
  0x95   :  { %6418 = vmatpush3.msra.mxu1 %v96_v0  ;;  %6419 = vmatprep.mubr.msk.f32.mxu1 %vm6800_vm1, %v6799_v1 }
  0x96   :  { %6409 = vmatmul.mubr.msk.f32.vlgmr.msra.gmra.mxu0 %vm124_vm0, %v7111_v39  ;;  %6420 = vmatmul.mubr.msk.f32.vlgmr.msra.gmra.mxu1 %vm124_vm0, %v7116_v40 }
  0x97   :  { %6422 = vmatprep.subr.mxu0 %v6799_v1  ;;  %6433 = vmatprep.subr.mxu1 %v6799_v1 }
  0x98   :  { %6423 = vmatpush3.msra.mxu0 %v103_v2  ;;  %6434 = vmatpush3.msra.mxu1 %v103_v2 }
  0x99   :  { %6424 = vmatprep.subr.mxu0 %v6799_v1  ;;  %6435 = vmatprep.subr.mxu1 %v6799_v1 }
  0x9a   :  { %6425 = vmatpush3.msra.mxu0 %v102_v3  ;;  %6436 = vmatpush3.msra.mxu1 %v102_v3 }
  0x9b   :  { %6426 = vmatprep.subr.mxu0 %v6799_v1  ;;  %6437 = vmatprep.subr.mxu1 %v6799_v1 }
  0x9c   :  { %6427 = vmatpush3.msra.mxu0 %v101_v4  ;;  %6438 = vmatpush3.msra.mxu1 %v101_v4 }
  0x9d   :  { %6428 = vmatprep.subr.mxu0 %v6799_v1  ;;  %6439 = vmatprep.subr.mxu1 %v6799_v1 }
  0x9e   :  { %6429 = vmatpush3.msra.mxu0 %v100_v5  ;;  %6430 = vmatprep.mubr.msk.f32.mxu0 %vm6800_vm1, %v6799_v1 }
  0x9f   :  { %6440 = vmatpush3.msra.mxu1 %v100_v5  ;;  %6441 = vmatprep.mubr.msk.f32.mxu1 %vm6800_vm1, %v6799_v1 }
  0xa0   :  { %6431 = vmatmul.mubr.msk.f32.vlgmr.msra.gmra.mxu0 %vm124_vm0, %v7111_v39  ;;  %6442 = vmatmul.mubr.msk.f32.vlgmr.msra.gmra.mxu1 %vm124_vm0, %v7116_v40 }
  0xa1   :  { %6444 = vmatprep.subr.mxu0 %v6799_v1  ;;  %6455 = vmatprep.subr.mxu1 %v6799_v1 }
  0xa2   :  { %6445 = vmatpush3.msra.mxu0 %v107_v6  ;;  %6456 = vmatpush3.msra.mxu1 %v107_v6 }
  0xa3   :  { %6446 = vmatprep.subr.mxu0 %v6799_v1  ;;  %6457 = vmatprep.subr.mxu1 %v6799_v1 }
  0xa4   :  { %6447 = vmatpush3.msra.mxu0 %v106_v7  ;;  %6458 = vmatpush3.msra.mxu1 %v106_v7 }
  0xa5   :  { %6448 = vmatprep.subr.mxu0 %v6799_v1  ;;  %6459 = vmatprep.subr.mxu1 %v6799_v1 }
  0xa6   :  { %6449 = vmatpush3.msra.mxu0 %v105_v8  ;;  %6460 = vmatpush3.msra.mxu1 %v105_v8 }
  0xa7   :  { %6450 = vmatprep.subr.mxu0 %v6799_v1  ;;  %6461 = vmatprep.subr.mxu1 %v6799_v1 }
  0xa8   :  { %6451 = vmatpush3.msra.mxu0 %v104_v9  ;;  %6462 = vmatpush3.msra.mxu1 %v104_v9 }
  0xa9   :  { %6452 = vmatprep.mubr.msk.f32.mxu0 %vm6800_vm1, %v6799_v1  ;;  %6463 = vmatprep.mubr.msk.f32.mxu1 %vm6800_vm1, %v6799_v1 }
  0xaa   :  { %6466 = vmatprep.subr.mxu0 %v6799_v1  ;;  %6477 = vmatprep.subr.mxu1 %v6799_v1 }
  0xab   :  { %6453 = vmatmul.mubr.msk.f32.vlgmr.msra.gmra.mxu0 %vm124_vm0, %v7345_v10  ;;  %6464 = vmatmul.mubr.msk.f32.vlgmr.msra.gmra.mxu1 %vm124_vm0, %v7350_v11 }
  0xac   :  { %6467 = vmatpush3.msra.mxu0 %v111_v12  ;;  %6478 = vmatpush3.msra.mxu1 %v111_v12 }
  0xad   :  { %6468 = vmatprep.subr.mxu0 %v6799_v1  ;;  %6479 = vmatprep.subr.mxu1 %v6799_v1 }
  0xae   :  { %6469 = vmatpush3.msra.mxu0 %v110_v13  ;;  %6480 = vmatpush3.msra.mxu1 %v110_v13 }
  0xaf   :  { %6470 = vmatprep.subr.mxu0 %v6799_v1  ;;  %6481 = vmatprep.subr.mxu1 %v6799_v1 }
  0xb0   :  { %6471 = vmatpush3.msra.mxu0 %v109_v14  ;;  %6482 = vmatpush3.msra.mxu1 %v109_v14 }
  0xb1   :  { %6472 = vmatprep.subr.mxu0 %v6799_v1  ;;  %6483 = vmatprep.subr.mxu1 %v6799_v1 }
  0xb2   :  { %6473 = vmatpush3.msra.mxu0 %v108_v15  ;;  %6484 = vmatpush3.msra.mxu1 %v108_v15 }
  0xb3   :  { %6474 = vmatprep.mubr.msk.f32.mxu0 %vm6800_vm1, %v6799_v1  ;;  %6485 = vmatprep.mubr.msk.f32.mxu1 %vm6800_vm1, %v6799_v1 }
  0xb4   :  { %6488 = vmatprep.subr.mxu0 %v6799_v1  ;;  %6499 = vmatprep.subr.mxu1 %v6799_v1 }
  0xb5   :  { %6475 = vmatmul.mubr.msk.f32.vlgmr.msra.gmra.mxu0 %vm124_vm0, %v7345_v10  ;;  %6486 = vmatmul.mubr.msk.f32.vlgmr.msra.gmra.mxu1 %vm124_vm0, %v7350_v11 }
  0xb6   :  { %6489 = vmatpush3.msra.mxu0 %v115_v16  ;;  %6500 = vmatpush3.msra.mxu1 %v115_v16 }
  0xb7   :  { %6490 = vmatprep.subr.mxu0 %v6799_v1  ;;  %6501 = vmatprep.subr.mxu1 %v6799_v1 }
  0xb8   :  { %6491 = vmatpush3.msra.mxu0 %v114_v17  ;;  %6502 = vmatpush3.msra.mxu1 %v114_v17 }
  0xb9   :  { %6492 = vmatprep.subr.mxu0 %v6799_v1  ;;  %6503 = vmatprep.subr.mxu1 %v6799_v1 }
  0xba   :  { %6493 = vmatpush3.msra.mxu0 %v113_v18  ;;  %6504 = vmatpush3.msra.mxu1 %v113_v18 }
  0xbb   :  { %6494 = vmatprep.subr.mxu0 %v6799_v1  ;;  %6505 = vmatprep.subr.mxu1 %v6799_v1 }
  0xbc   :  { %6495 = vmatpush3.msra.mxu0 %v112_v19  ;;  %6506 = vmatpush3.msra.mxu1 %v112_v19 }
  0xbd   :  { %6496 = vmatprep.mubr.msk.f32.mxu0 %vm6800_vm1, %v6799_v1  ;;  %6507 = vmatprep.mubr.msk.f32.mxu1 %vm6800_vm1, %v6799_v1 }
  0xbe   :  { %6510 = vmatprep.subr.mxu0 %v6799_v1  ;;  %6521 = vmatprep.subr.mxu1 %v6799_v1 }
  0xbf   :  { %6497 = vmatmul.mubr.msk.f32.vlgmr.msra.gmra.mxu0 %vm124_vm0, %v7345_v10  ;;  %6508 = vmatmul.mubr.msk.f32.vlgmr.msra.gmra.mxu1 %vm124_vm0, %v7350_v11 }
  0xc0   :  { %6511 = vmatpush3.msra.mxu0 %v119_v20  ;;  %6522 = vmatpush3.msra.mxu1 %v119_v20 }
  0xc1   :  { %6512 = vmatprep.subr.mxu0 %v6799_v1  ;;  %6523 = vmatprep.subr.mxu1 %v6799_v1 }
  0xc2   :  { %6513 = vmatpush3.msra.mxu0 %v118_v21  ;;  %6524 = vmatpush3.msra.mxu1 %v118_v21 }
  0xc3   :  { %6514 = vmatprep.subr.mxu0 %v6799_v1  ;;  %6525 = vmatprep.subr.mxu1 %v6799_v1 }
  0xc4   :  { %6515 = vmatpush3.msra.mxu0 %v117_v22  ;;  %6526 = vmatpush3.msra.mxu1 %v117_v22 }
  0xc5   :  { %6516 = vmatprep.subr.mxu0 %v6799_v1  ;;  %6527 = vmatprep.subr.mxu1 %v6799_v1 }
  0xc6   :  { %6517 = vmatpush3.msra.mxu0 %v116_v23  ;;  %6518 = vmatprep.mubr.msk.f32.mxu0 %vm6800_vm1, %v6799_v1 }
  0xc7   :  { %6528 = vmatpush3.msra.mxu1 %v116_v23  ;;  %6529 = vmatprep.mubr.msk.f32.mxu1 %vm6800_vm1, %v6799_v1 }
  0xc8   :  { %6519 = vmatmul.mubr.msk.f32.vlgmr.msra.gmra.mxu0 %vm124_vm0, %v7345_v10  ;;  %6530 = vmatmul.mubr.msk.f32.vlgmr.msra.gmra.mxu1 %vm124_vm0, %v7350_v11 }
  0xc9   :  { %6532 = vmatprep.subr.mxu0 %v6799_v1  ;;  %6537 = vmatprep.subr.mxu1 %v6799_v1 }
  0xca   :  { %v194_v24 = vpop.f32.mrf.mxu0  ;;  %v267_v25 = vpop.f32.mrf.mxu1  ;;  %6534 = vmatprep.mubr.msk.f32.mxu0 %vm6800_vm1, %v6799_v1  ;;  %6539 = vmatprep.mubr.msk.f32.mxu1 %vm6800_vm1, %v6799_v1 }
  0xcc   :  { %v6102_v26 = vpop.f32.mrf.mxu0  ;;  %v6113_v27 = vpop.f32.mrf.mxu1 }
  0xd4   :  { %v337_v28 = vpop.f32.mrf.mxu0  ;;  %v407_v29 = vpop.f32.mrf.mxu1 }
  0xd6   :  { %v6124_v30 = vpop.f32.mrf.mxu0  ;;  %v6135_v31 = vpop.f32.mrf.mxu1 }
  0xde   :  { %v477_v32 = vpop.f32.mrf.mxu0  ;;  %v547_v33 = vpop.f32.mrf.mxu1 }
  0xe0   :  { %v6146_v34 = vpop.f32.mrf.mxu0  ;;  %v6157_v35 = vpop.f32.mrf.mxu1 }
  0xe8   :  { %v7450_v36 = vpop.f32.mrf.mxu0  ;;  %v7452_v37 = vpop.f32.mrf.mxu1 }
  0xea   :  { %v6168_v38 = vpop.f32.mrf.mxu0  ;;  %v6179_v39 = vpop.f32.mrf.mxu1 }
  0xf2   :  { %v7454_v40 = vpop.f32.mrf.mxu0  ;;  %v7456_v41 = vpop.f32.mrf.mxu1 }
  0xf4   :  { %v6190_v42 = vpop.f32.mrf.mxu0  ;;  %v6201_v43 = vpop.f32.mrf.mxu1 }
  0xfc   :  { %v7458_v44 = vpop.f32.mrf.mxu0  ;;  %v7460_v45 = vpop.f32.mrf.mxu1 }
  0xfe   :  { %v6212_v46 = vpop.f32.mrf.mxu0  ;;  %v6223_v47 = vpop.f32.mrf.mxu1 }
 0x106   :  { %v7462_v48 = vpop.f32.mrf.mxu0  ;;  %v7464_v49 = vpop.f32.mrf.mxu1 }
 0x108   :  { %v6234_v50 = vpop.f32.mrf.mxu0  ;;  %v6245_v51 = vpop.f32.mrf.mxu1 }
 0x110   :  { %v7466_v52 = vpop.f32.mrf.mxu0  ;;  %v7468_v53 = vpop.f32.mrf.mxu1 }
 0x112   :  { %v6256_v54 = vpop.f32.mrf.mxu0  ;;  %v6267_v55 = vpop.f32.mrf.mxu1 }
 0x11a   :  { %v1320_v56 = vpop.f32.mrf.mxu0  ;;  %v1393_v57 = vpop.f32.mrf.mxu1 }
 0x11b   :  { %6533 = vmatpush3.xpose.msk.msra.mxu0 %vm2943_vm2, %v1320_v56  ;;  %6538 = vmatpush3.xpose.msk.msra.mxu1 %vm2943_vm2, %v1393_v57 }
 0x11c   :  { %v6278_v58 = vpop.f32.mrf.mxu0  ;;  %v6289_v59 = vpop.f32.mrf.mxu1  ;;  %6542 = vmatprep.subr.mxu0 %v6799_v1  ;;  %6547 = vmatprep.subr.mxu1 %v6799_v1 }
 0x11e   :  { %6535 = vmatmul.mubr.msk.f32.vlgmr.msra.gmra.mxu0 %vm2943_vm2, %v194_v24  ;;  %6540 = vmatmul.mubr.msk.f32.vlgmr.msra.gmra.mxu1 %vm2943_vm2, %v267_v25 }
 0x11f   :  { %6544 = vmatprep.mubr.msk.f32.mxu0 %vm6800_vm1, %v6799_v1  ;;  %6549 = vmatprep.mubr.msk.f32.mxu1 %vm6800_vm1, %v6799_v1 }
 0x124   :  { %v1463_v60 = vpop.f32.mrf.mxu0  ;;  %v1533_v61 = vpop.f32.mrf.mxu1 }
 0x125   :  { %6543 = vmatpush3.xpose.msk.msra.mxu0 %vm2943_vm2, %v1463_v60  ;;  %6548 = vmatpush3.xpose.msk.msra.mxu1 %vm2943_vm2, %v1533_v61 }
 0x126   :  { %v6300_v62 = vpop.f32.mrf.mxu0  ;;  %v6311_v63 = vpop.f32.mrf.mxu1  ;;  %6552 = vmatprep.subr.mxu0 %v6799_v1  ;;  %6557 = vmatprep.subr.mxu1 %v6799_v1 }
 0x128   :  { %6545 = vmatmul.mubr.msk.f32.vlgmr.msra.gmra.mxu0 %vm2943_vm2, %v337_v28  ;;  %6550 = vmatmul.mubr.msk.f32.vlgmr.msra.gmra.mxu1 %vm2943_vm2, %v407_v29 }
 0x129   :  { %6554 = vmatprep.mubr.msk.f32.mxu0 %vm6800_vm1, %v6799_v1  ;;  %6559 = vmatprep.mubr.msk.f32.mxu1 %vm6800_vm1, %v6799_v1 }
 0x12e   :  { %v1603_v0 = vpop.f32.mrf.mxu0  ;;  %v1673_v2 = vpop.f32.mrf.mxu1 }
 0x12f   :  { %6553 = vmatpush3.xpose.msk.msra.mxu0 %vm2943_vm2, %v1603_v0  ;;  %6558 = vmatpush3.xpose.msk.msra.mxu1 %vm2943_vm2, %v1673_v2 }
 0x130   :  { %v6322_v3 = vpop.f32.mrf.mxu0  ;;  %v6333_v4 = vpop.f32.mrf.mxu1  ;;  %6562 = vmatprep.subr.mxu0 %v6799_v1  ;;  %6567 = vmatprep.subr.mxu1 %v6799_v1 }
 0x132   :  { %6555 = vmatmul.mubr.msk.f32.vlgmr.msra.gmra.mxu0 %vm2943_vm2, %v477_v32  ;;  %6560 = vmatmul.mubr.msk.f32.vlgmr.msra.gmra.mxu1 %vm2943_vm2, %v547_v33 }
 0x133   :  { %6564 = vmatprep.mubr.msk.f32.mxu0 %vm6800_vm1, %v6799_v1  ;;  %6569 = vmatprep.mubr.msk.f32.mxu1 %vm6800_vm1, %v6799_v1 }
 0x138   :  { %v1743_v5 = vpop.f32.mrf.mxu0  ;;  %v1813_v6 = vpop.f32.mrf.mxu1 }
 0x139   :  { %6563 = vmatpush3.xpose.msk.msra.mxu0 %vm2943_vm2, %v1743_v5  ;;  %6568 = vmatpush3.xpose.msk.msra.mxu1 %vm2943_vm2, %v1813_v6 }
 0x13a   :  { %v6344_v7 = vpop.f32.mrf.mxu0  ;;  %v6355_v8 = vpop.f32.mrf.mxu1  ;;  %6572 = vmatprep.subr.mxu0 %v6799_v1  ;;  %6577 = vmatprep.subr.mxu1 %v6799_v1 }
 0x13c   :  { %6565 = vmatmul.mubr.msk.f32.vlgmr.msra.gmra.mxu0 %vm2943_vm2, %v7450_v36  ;;  %6570 = vmatmul.mubr.msk.f32.vlgmr.msra.gmra.mxu1 %vm2943_vm2, %v7452_v37 }
 0x13d   :  { %6574 = vmatprep.mubr.msk.f32.mxu0 %vm6800_vm1, %v6799_v1  ;;  %6579 = vmatprep.mubr.msk.f32.mxu1 %vm6800_vm1, %v6799_v1 }
 0x142   :  { %v1883_v9 = vpop.f32.mrf.mxu0  ;;  %v1953_v10 = vpop.f32.mrf.mxu1 }
 0x143   :  { %6573 = vmatpush3.xpose.msk.msra.mxu0 %vm2943_vm2, %v1883_v9  ;;  %6578 = vmatpush3.xpose.msk.msra.mxu1 %vm2943_vm2, %v1953_v10 }
 0x144   :  { %v6366_v11 = vpop.f32.mrf.mxu0  ;;  %v6377_v12 = vpop.f32.mrf.mxu1  ;;  %6582 = vmatprep.subr.mxu0 %v6799_v1  ;;  %6587 = vmatprep.subr.mxu1 %v6799_v1 }
 0x146   :  { %6575 = vmatmul.mubr.msk.f32.vlgmr.msra.gmra.mxu0 %vm2943_vm2, %v7454_v40  ;;  %6580 = vmatmul.mubr.msk.f32.vlgmr.msra.gmra.mxu1 %vm2943_vm2, %v7456_v41 }
 0x147   :  { %6584 = vmatprep.mubr.msk.f32.mxu0 %vm6800_vm1, %v6799_v1  ;;  %6589 = vmatprep.mubr.msk.f32.mxu1 %vm6800_vm1, %v6799_v1 }
 0x14c   :  { %v2023_v13 = vpop.f32.mrf.mxu0  ;;  %v2093_v14 = vpop.f32.mrf.mxu1 }
 0x14d   :  { %6583 = vmatpush3.xpose.msk.msra.mxu0 %vm2943_vm2, %v2023_v13  ;;  %6588 = vmatpush3.xpose.msk.msra.mxu1 %vm2943_vm2, %v2093_v14 }
 0x14e   :  { %v6388_v15 = vpop.f32.mrf.mxu0  ;;  %v6399_v16 = vpop.f32.mrf.mxu1  ;;  %6592 = vmatprep.subr.mxu0 %v6799_v1  ;;  %6597 = vmatprep.subr.mxu1 %v6799_v1 }
 0x150   :  { %6585 = vmatmul.mubr.msk.f32.vlgmr.msra.gmra.mxu0 %vm2943_vm2, %v7458_v44  ;;  %6590 = vmatmul.mubr.msk.f32.vlgmr.msra.gmra.mxu1 %vm2943_vm2, %v7460_v45 }
 0x151   :  { %6594 = vmatprep.mubr.msk.f32.mxu0 %vm6800_vm1, %v6799_v1  ;;  %6599 = vmatprep.mubr.msk.f32.mxu1 %vm6800_vm1, %v6799_v1 }
 0x156   :  { %v2163_v17 = vpop.f32.mrf.mxu0  ;;  %v2233_v18 = vpop.f32.mrf.mxu1 }
 0x157   :  { %6593 = vmatpush3.xpose.msk.msra.mxu0 %vm2943_vm2, %v2163_v17  ;;  %6598 = vmatpush3.xpose.msk.msra.mxu1 %vm2943_vm2, %v2233_v18 }
 0x158   :  { %v6410_v19 = vpop.f32.mrf.mxu0  ;;  %v6421_v20 = vpop.f32.mrf.mxu1  ;;  %6602 = vmatprep.subr.mxu0 %v6799_v1  ;;  %6607 = vmatprep.subr.mxu1 %v6799_v1 }
 0x15a   :  { %6595 = vmatmul.mubr.msk.f32.vlgmr.msra.gmra.mxu0 %vm2943_vm2, %v7462_v48  ;;  %6600 = vmatmul.mubr.msk.f32.vlgmr.msra.gmra.mxu1 %vm2943_vm2, %v7464_v49 }
 0x15b   :  { %6604 = vmatprep.mubr.msk.f32.mxu0 %vm6800_vm1, %v6799_v1  ;;  %6609 = vmatprep.mubr.msk.f32.mxu1 %vm6800_vm1, %v6799_v1 }
 0x160   :  { %v2303_v21 = vpop.f32.mrf.mxu0  ;;  %v2373_v22 = vpop.f32.mrf.mxu1 }
 0x161   :  { %6603 = vmatpush3.xpose.msk.msra.mxu0 %vm2943_vm2, %v2303_v21  ;;  %6608 = vmatpush3.xpose.msk.msra.mxu1 %vm2943_vm2, %v2373_v22 }
 0x162   :  { %v6432_v23 = vpop.f32.mrf.mxu0  ;;  %v6443_v24 = vpop.f32.mrf.mxu1  ;;  %6612 = vmatprep.subr.mxu0 %v6799_v1  ;;  %6617 = vmatprep.subr.mxu1 %v6799_v1 }
 0x164   :  { %6605 = vmatmul.mubr.msk.f32.vlgmr.msra.gmra.mxu0 %vm2943_vm2, %v7466_v52  ;;  %6610 = vmatmul.mubr.msk.f32.vlgmr.msra.gmra.mxu1 %vm2943_vm2, %v7468_v53 }
 0x165   :  { %6614 = vmatprep.mubr.msk.f32.mxu0 %vm6800_vm1, %v6799_v1  ;;  %6619 = vmatprep.mubr.msk.f32.mxu1 %vm6800_vm1, %v6799_v1 }
 0x16b   :  { %v2446_v25 = vpop.f32.mrf.mxu0  ;;  %v2519_v26 = vpop.f32.mrf.mxu1 }
 0x16c   :  { %6613 = vmatpush3.msra.mxu0 %v2446_v25  ;;  %6618 = vmatpush3.msra.mxu1 %v2519_v26 }
 0x16d   :  { %v6454_v27 = vpop.f32.mrf.mxu0  ;;  %v6465_v28 = vpop.f32.mrf.mxu1  ;;  %6622 = vmatprep.subr.mxu0 %v6799_v1  ;;  %6627 = vmatprep.subr.mxu1 %v6799_v1 }
 0x175   :  { %v7562_v29 = vpop.f32.mrf.mxu0  ;;  %v7564_v30 = vpop.f32.mrf.mxu1 }
 0x177   :  { %v6476_v31 = vpop.f32.mrf.mxu0  ;;  %v6487_v32 = vpop.f32.mrf.mxu1 }
 0x17f   :  { %v7566_v33 = vpop.f32.mrf.mxu0  ;;  %v7568_v34 = vpop.f32.mrf.mxu1 }
 0x181   :  { %v6498_v35 = vpop.f32.mrf.mxu0  ;;  %v6509_v36 = vpop.f32.mrf.mxu1 }
 0x188   :  { %v7570_v37 = vpop.f32.mrf.mxu0  ;;  %v7572_v38 = vpop.f32.mrf.mxu1 }
 0x18a   :  { %v6520_v39 = vpop.f32.mrf.mxu0  ;;  %v6531_v40 = vpop.f32.mrf.mxu1 }
 0x1de   :  { %v3016_v41 = vpop.f32.mrf.mxu0  ;;  %v3092_v42 = vpop.f32.mrf.mxu1 }
 0x1df   :  { %v4160_v43 = vmul.f32 0.5, %v3016_v41  ;;  %v4161_v44 = vmul.f32 0.5, %v3092_v42 }
 0x1e0   :  { %v6536_v45 = vpop.f32.mrf.mxu0  ;;  %v6541_v46 = vpop.f32.mrf.mxu1 }
 0x1e1   :  { %vm4176_vm3 = vcmp.ne.f32.partialorder %v4160_v43, %v4160_v43  ;;  %vm4177_vm4 = vcmp.ne.f32.partialorder %v4161_v44, %v4161_v44 }
 0x1e2   :  { %v7574_v47 = vsel %vm4177_vm4, 0.0, %v4161_v44  ;;  %v7576_v48 = vsel %vm4176_vm3, 0.0, %v4160_v43 }
 0x1e3   :  { %v5795_v49 = vclamps-f32 %v7576_v48, 3.4028235e+38  ;;  %v5796_v51 = vclamps-f32 %v7574_v47, 3.4028235e+38 }
 0x1e5   :  { %v4241_v50 = vsel %vm4240_vm5, %v5795_v49, -inf  ;;  %v4244_v56 = vsel %vm4240_vm5, %v5796_v51, -inf }
 0x1e6   :  { %4242 = vmax.xlane.f32.xlu1 %v4241_v50 }
 0x1e8   :  { %v3244_v52 = vpop.f32.mrf.mxu1  ;;  %v3168_v53 = vpop.f32.mrf.mxu0 }
 0x1e9   :  { %v4163_v54 = vmul.f32 0.5, %v3244_v52  ;;  %v4162_v55 = vmul.f32 0.5, %v3168_v53 }
 0x1ea   :  { %v6546_v57 = vpop.f32.mrf.mxu0  ;;  %v6551_v58 = vpop.f32.mrf.mxu1  ;;  %4245 = vmax.xlane.f32.xlu1 %v4244_v56 }
 0x1eb   :  { %vm4179_vm6 = vcmp.ne.f32.partialorder %v4163_v54, %v4163_v54  ;;  %vm4178_vm7 = vcmp.ne.f32.partialorder %v4162_v55, %v4162_v55 }
 0x1ec   :  { %v7586_v59 = vsel %vm4179_vm6, 0.0, %v4163_v54  ;;  %v7588_v60 = vsel %vm4178_vm7, 0.0, %v4162_v55 }
 0x1ed   :  { %v5798_v61 = vclamps-f32 %v7586_v59, 3.4028235e+38  ;;  %v5797_v62 = vclamps-f32 %v7588_v60, 3.4028235e+38 }
 0x1ef   :  { %v4250_v63 = vsel %vm4240_vm5, %v5798_v61, -inf  ;;  %v4247_v0 = vsel %vm4240_vm5, %v5797_v62, -inf }
 0x1f0   :  { %4251 = vmax.xlane.f32.xlu1 %v4250_v63  ;;  %4248 = vmax.xlane.f32.xlu0 %v4247_v0 }
 0x1f2   :  { %v3396_v2 = vpop.f32.mrf.mxu1  ;;  %v3320_v3 = vpop.f32.mrf.mxu0 }
 0x1f3   :  { %v4165_v4 = vmul.f32 0.5, %v3396_v2  ;;  %v4164_v5 = vmul.f32 0.5, %v3320_v3 }
 0x1f4   :  { %v6556_v6 = vpop.f32.mrf.mxu0  ;;  %v6561_v7 = vpop.f32.mrf.mxu1 }
 0x1f5   :  { %vm4181_vm8 = vcmp.ne.f32.partialorder %v4165_v4, %v4165_v4  ;;  %vm4180_vm9 = vcmp.ne.f32.partialorder %v4164_v5, %v4164_v5 }
 0x1f6   :  { %v7598_v8 = vsel %vm4181_vm8, 0.0, %v4165_v4  ;;  %v7600_v9 = vsel %vm4180_vm9, 0.0, %v4164_v5 }
 0x1f7   :  { %v5800_v10 = vclamps-f32 %v7598_v8, 3.4028235e+38  ;;  %v5799_v11 = vclamps-f32 %v7600_v9, 3.4028235e+38 }
 0x1f9   :  { %v4256_v12 = vsel %vm4240_vm5, %v5800_v10, -inf  ;;  %v4253_v13 = vsel %vm4240_vm5, %v5799_v11, -inf }
 0x1fa   :  { %4257 = vmax.xlane.f32.xlu1 %v4256_v12  ;;  %4254 = vmax.xlane.f32.xlu0 %v4253_v13 }
 0x1fc   :  { %v3548_v14 = vpop.f32.mrf.mxu1  ;;  %v3472_v15 = vpop.f32.mrf.mxu0 }
 0x1fd   :  { %v4167_v3 = vmul.f32 0.5, %v3548_v14  ;;  %v4166_v4 = vmul.f32 0.5, %v3472_v15 }
 0x1fe   :  { %v6566_v16 = vpop.f32.mrf.mxu0  ;;  %v6571_v17 = vpop.f32.mrf.mxu1 }
 0x1ff   :  { %vm4183_vm2 = vcmp.ne.f32.partialorder %v4167_v3, %v4167_v3  ;;  %vm4182_vm3 = vcmp.ne.f32.partialorder %v4166_v4, %v4166_v4 }
 0x200   :  { %v7646_v14 = vsel %vm4183_vm2, 0.0, %v4167_v3  ;;  %v7648_v15 = vsel %vm4182_vm3, 0.0, %v4166_v4 }
 0x206   :  { %v3624_v18 = vpop.f32.mrf.mxu0  ;;  %v3700_v19 = vpop.f32.mrf.mxu1 }
 0x207   :  { %v4168_v20 = vmul.f32 0.5, %v3624_v18  ;;  %v4169_v21 = vmul.f32 0.5, %v3700_v19 }
 0x208   :  { %v6576_v22 = vpop.f32.mrf.mxu0  ;;  %v6581_v23 = vpop.f32.mrf.mxu1 }
 0x209   :  { %vm4184_vm10 = vcmp.ne.f32.partialorder %v4168_v20, %v4168_v20  ;;  %vm4185_vm11 = vcmp.ne.f32.partialorder %v4169_v21, %v4169_v21 }
 0x20a   :  { %v7610_v24 = vsel %vm4184_vm10, 0.0, %v4168_v20  ;;  %v7612_v25 = vsel %vm4185_vm11, 0.0, %v4169_v21 }
 0x20b   :  { %v5803_v26 = vclamps-f32 %v7610_v24, 3.4028235e+38  ;;  %v5804_v28 = vclamps-f32 %v7612_v25, 3.4028235e+38 }
 0x20d   :  { %v4265_v27 = vsel %vm4240_vm5, %v5803_v26, -inf  ;;  %v4268_v39 = vsel %vm4240_vm5, %v5804_v28, -inf }
 0x20e   :  { %4266 = vmax.xlane.f32.xlu0 %v4265_v27 }
 0x210   :  { %v3852_v31 = vpop.f32.mrf.mxu1  ;;  %v3776_v32 = vpop.f32.mrf.mxu0 }
 0x211   :  { %v4171_v35 = vmul.f32 0.5, %v3852_v31  ;;  %v4170_v36 = vmul.f32 0.5, %v3776_v32  ;;  %v5802_v31 = vclamps-f32 %v7646_v14, 3.4028235e+38  ;;  %v5801_v32 = vclamps-f32 %v7648_v15, 3.4028235e+38 }
 0x212   :  { %v6586_v40 = vpop.f32.mrf.mxu0  ;;  %v6591_v41 = vpop.f32.mrf.mxu1  ;;  %4269 = vmax.xlane.f32.xlu0 %v4268_v39 }
 0x213   :  { %vm4187_vm12 = vcmp.ne.f32.partialorder %v4171_v35, %v4171_v35  ;;  %vm4186_vm13 = vcmp.ne.f32.partialorder %v4170_v36, %v4170_v36 }
 0x214   :  { %v7622_v42 = vsel %vm4187_vm12, 0.0, %v4171_v35  ;;  %v7624_v43 = vsel %vm4186_vm13, 0.0, %v4170_v36  ;;  %v4262_v35 = vsel %vm4240_vm5, %v5802_v31, -inf  ;;  %v4259_v36 = vsel %vm4240_vm5, %v5801_v32, -inf }
 0x215   :  { %v5806_v44 = vclamps-f32 %v7622_v42, 3.4028235e+38  ;;  %v5805_v45 = vclamps-f32 %v7624_v43, 3.4028235e+38 }
 0x217   :  { %v4274_v46 = vsel %vm4240_vm5, %v5806_v44, -inf  ;;  %v4271_v50 = vsel %vm4240_vm5, %v5805_v45, -inf }
 0x218   :  { %4275 = vmax.xlane.f32.xlu1 %v4274_v46  ;;  %4272 = vmax.xlane.f32.xlu0 %v4271_v50 }
 0x21a   :  { %v4004_v52 = vpop.f32.mrf.mxu1  ;;  %v3928_v53 = vpop.f32.mrf.mxu0 }
 0x21b   :  { %v4173_v54 = vmul.f32 0.5, %v4004_v52  ;;  %v4172_v55 = vmul.f32 0.5, %v3928_v53 }
 0x21c   :  { %v6596_v56 = vpop.f32.mrf.mxu0  ;;  %v6601_v57 = vpop.f32.mrf.mxu1 }
 0x21d   :  { %vm4189_vm14 = vcmp.ne.f32.partialorder %v4173_v54, %v4173_v54  ;;  %vm4188_vm15 = vcmp.ne.f32.partialorder %v4172_v55, %v4172_v55 }
 0x21e   :  { %v7634_v58 = vsel %vm4189_vm14, 0.0, %v4173_v54  ;;  %v7636_v63 = vsel %vm4188_vm15, 0.0, %v4172_v55 }
 0x21f   :  { %v5808_v0 = vclamps-f32 %v7634_v58, 3.4028235e+38  ;;  %v5807_v2 = vclamps-f32 %v7636_v63, 3.4028235e+38 }
 0x221   :  { %v4280_v5 = vsel %vm4240_vm5, %v5808_v0, -inf  ;;  %v4277_v6 = vsel %vm4240_vm5, %v5807_v2, -inf }
 0x222   :  { %4281 = vmax.xlane.f32.xlu1 %v4280_v5  ;;  %4278 = vmax.xlane.f32.xlu0 %v4277_v6 }
 0x224   :  { %v4156_v7 = vpop.f32.mrf.mxu1  ;;  %v4080_v12 = vpop.f32.mrf.mxu0 }
 0x225   :  { %v4175_v13 = vmul.f32 0.5, %v4156_v7  ;;  %v4174_v16 = vmul.f32 0.5, %v4080_v12 }
 0x226   :  { %v6606_v17 = vpop.f32.mrf.mxu0  ;;  %v6611_v18 = vpop.f32.mrf.mxu1 }
 0x227   :  { %vm4191_vm4 = vcmp.ne.f32.partialorder %v4175_v13, %v4175_v13  ;;  %vm4190_vm6 = vcmp.ne.f32.partialorder %v4174_v16, %v4174_v16 }
 0x228   :  { %v7650_v19 = vsel %vm4191_vm4, 0.0, %v4175_v13  ;;  %v7652_v20 = vsel %vm4190_vm6, 0.0, %v4174_v16 }
 0x229   :  { %v5810_v21 = vclamps-f32 %v7650_v19, 3.4028235e+38  ;;  %v5809_v22 = vclamps-f32 %v7652_v20, 3.4028235e+38 }
 0x22b   :  { %v4286_v23 = vsel %vm4240_vm5, %v5810_v21, -inf  ;;  %v4283_v27 = vsel %vm4240_vm5, %v5809_v22, -inf }
 0x22c   :  { %4287 = vmax.xlane.f32.xlu1 %v4286_v23  ;;  %4284 = vmax.xlane.f32.xlu0 %v4283_v27 }
 0x230   :  { %4263 = vmax.xlane.f32.xlu1 %v4262_v35  ;;  %4260 = vmax.xlane.f32.xlu0 %v4259_v36 }
 0x26f   :  { %v4243_v39 = vpop.xlane.xlu1 %4242 }
 0x270   :  { %v4289_v40 = vsub.f32 %v5795_v49, %v4243_v39 }
 0x272   :  { %v4305_v41 = vmul.f32 1.442695, %v4289_v40 }
 0x273   :  { %v4246_v46 = vpop.xlane.xlu1 %4245 }
 0x274   :  { %6697 = vpow2.f32 %v4305_v41  ;;  %v4290_v50 = vsub.f32 %v5796_v51, %v4246_v46 }
 0x276   :  { %v4307_v52 = vmul.f32 1.442695, %v4290_v50 }
 0x278   :  { %6699 = vpow2.f32 %v4307_v52 }
 0x279   :  { %v4252_v53 = vpop.xlane.xlu1 %4251  ;;  %v4249_v54 = vpop.xlane.xlu0 %4248 }
 0x27a   :  { %v4292_v55 = vsub.f32 %v5798_v61, %v4252_v53  ;;  %v4291_v56 = vsub.f32 %v5797_v62, %v4249_v54 }
 0x27c   :  { %v4311_v57 = vmul.f32 1.442695, %v4292_v55  ;;  %v4309_v3 = vmul.f32 1.442695, %v4291_v56 }
 0x27e   :  { %6701 = vpow2.f32 %v4311_v57 }
 0x27f   :  { %6703 = vpow2.f32 %v4309_v3 }
 0x281   :  { %v7678_v48 = vpop.eup %6697 }
 0x282   :  { %v4337_v47 = vsel %vm4240_vm5, %v7678_v48, 0.0 }
 0x283   :  { %v4258_v49 = vpop.xlane.xlu1 %4257  ;;  %v4255_v51 = vpop.xlane.xlu0 %4254  ;;  %4338 = vadd.xlane.f32.xlu0 %v4337_v47 }
 0x284   :  { %v4294_v4 = vsub.f32 %v5800_v10, %v4258_v49  ;;  %v4293_v59 = vsub.f32 %v5799_v11, %v4255_v51 }
 0x285   :  { %v7686_v60 = vpop.eup %6699 }
 0x286   :  { %v4315_v61 = vmul.f32 1.442695, %v4294_v4  ;;  %v4313_v62 = vmul.f32 1.442695, %v4293_v59  ;;  %v4340_v5 = vsel %vm4240_vm5, %v7686_v60, 0.0 }
 0x287   :  { %4341 = vadd.xlane.f32.xlu1 %v4340_v5 }
 0x288   :  { %6705 = vpow2.f32 %v4315_v61 }
 0x289   :  { %6707 = vpow2.f32 %v4313_v62 }
 0x28b   :  { %v7690_v6 = vpop.eup %6701 }
 0x28c   :  { %v7692_v7 = vpop.eup %6703  ;;  %v4346_v8 = vsel %vm4240_vm5, %v7690_v6, 0.0 }
 0x28d   :  { %4347 = vadd.xlane.f32.xlu1 %v4346_v8  ;;  %v4343_v9 = vsel %vm4240_vm5, %v7692_v7, 0.0 }
 0x28e   :  { %4344 = vadd.xlane.f32.xlu0 %v4343_v9 }
 0x295   :  { %v7698_v10 = vpop.eup %6705 }
 0x296   :  { %v7700_v11 = vpop.eup %6707  ;;  %v4352_v12 = vsel %vm4240_vm5, %v7698_v10, 0.0 }
 0x297   :  { %v4267_v13 = vpop.xlane.xlu0 %4266  ;;  %4353 = vadd.xlane.f32.xlu1 %v4352_v12  ;;  %v4349_v16 = vsel %vm4240_vm5, %v7700_v11, 0.0 }
 0x298   :  { %v4297_v17 = vsub.f32 %v5803_v26, %v4267_v13  ;;  %4350 = vadd.xlane.f32.xlu0 %v4349_v16 }
 0x29a   :  { %v4321_v18 = vmul.f32 1.442695, %v4297_v17 }
 0x29b   :  { %v4270_v23 = vpop.xlane.xlu0 %4269 }
 0x29c   :  { %6709 = vpow2.f32 %v4321_v18  ;;  %v4298_v27 = vsub.f32 %v5804_v28, %v4270_v23 }
 0x29e   :  { %v4323_v35 = vmul.f32 1.442695, %v4298_v27 }
 0x2a0   :  { %6711 = vpow2.f32 %v4323_v35 }
 0x2a1   :  { %v4276_v36 = vpop.xlane.xlu1 %4275  ;;  %v4273_v39 = vpop.xlane.xlu0 %4272 }
 0x2a2   :  { %v4300_v40 = vsub.f32 %v5806_v44, %v4276_v36  ;;  %v4299_v41 = vsub.f32 %v5805_v45, %v4273_v39 }
 0x2a4   :  { %v4327_v46 = vmul.f32 1.442695, %v4300_v40  ;;  %v4325_v24 = vmul.f32 1.442695, %v4299_v41 }
 0x2a6   :  { %6713 = vpow2.f32 %v4327_v46 }
 0x2a7   :  { %6715 = vpow2.f32 %v4325_v24  ;;  %v7769_v24 = vstv %s7943_s0 }
 0x2a9   :  { %v7714_v26 = vpop.eup %6709 }
 0x2aa   :  { %v4361_v25 = vsel %vm4240_vm5, %v7714_v26, 0.0 }
 0x2ab   :  { %v4282_v28 = vpop.xlane.xlu1 %4281  ;;  %v4279_v50 = vpop.xlane.xlu0 %4278  ;;  %4362 = vadd.xlane.f32.xlu0 %v4361_v25 }
 0x2ac   :  { %v4302_v52 = vsub.f32 %v5808_v0, %v4282_v28  ;;  %v4301_v42 = vsub.f32 %v5807_v2, %v4279_v50 }
 0x2ad   :  { %v7722_v43 = vpop.eup %6711 }
 0x2ae   :  { %v4331_v44 = vmul.f32 1.442695, %v4302_v52  ;;  %v4329_v45 = vmul.f32 1.442695, %v4301_v42  ;;  %v4364_v53 = vsel %vm4240_vm5, %v7722_v43, 0.0 }
 0x2af   :  { %4365 = vadd.xlane.f32.xlu1 %v4364_v53 }
 0x2b0   :  { %6717 = vpow2.f32 %v4331_v44 }
 0x2b1   :  { %6719 = vpow2.f32 %v4329_v45 }
 0x2b3   :  { %v7726_v54 = vpop.eup %6713 }
 0x2b4   :  { %v7728_v55 = vpop.eup %6715  ;;  %v4370_v58 = vsel %vm4240_vm5, %v7726_v54, 0.0 }
 0x2b5   :  { %v4288_v0 = vpop.xlane.xlu1 %4287  ;;  %v4285_v63 = vpop.xlane.xlu0 %4284  ;;  %4371 = vadd.xlane.f32.xlu1 %v4370_v58  ;;  %v4367_v2 = vsel %vm4240_vm5, %v7728_v55, 0.0 }
 0x2b6   :  { %v4304_v56 = vsub.f32 %v5810_v21, %v4288_v0  ;;  %v4303_v57 = vsub.f32 %v5809_v22, %v4285_v63  ;;  %4368 = vadd.xlane.f32.xlu0 %v4367_v2 }
 0x2b8   :  { %v4335_v3 = vmul.f32 1.442695, %v4304_v56  ;;  %v4333_v47 = vmul.f32 1.442695, %v4303_v57 }
 0x2b9   :  { %v4264_v49 = vpop.xlane.xlu1 %4263  ;;  %v4261_v51 = vpop.xlane.xlu0 %4260 }
 0x2ba   :  { %6721 = vpow2.f32 %v4335_v3  ;;  %v4296_v4 = vsub.f32 %v5802_v31, %v4264_v49  ;;  %v4295_v59 = vsub.f32 %v5801_v32, %v4261_v51 }
 0x2bb   :  { %6723 = vpow2.f32 %v4333_v47 }
 0x2bc   :  { %v4319_v61 = vmul.f32 1.442695, %v4296_v4  ;;  %v4317_v62 = vmul.f32 1.442695, %v4295_v59 }
 0x2bd   :  { %v7742_v19 = vpop.eup %6717 }
 0x2be   :  { %v7744_v21 = vpop.eup %6719  ;;  %6725 = vpow2.f32 %v4319_v61  ;;  %v4376_v20 = vsel %vm4240_vm5, %v7742_v19, 0.0 }
 0x2bf   :  { %6727 = vpow2.f32 %v4317_v62  ;;  %4377 = vadd.xlane.f32.xlu1 %v4376_v20  ;;  %v4373_v14 = vsel %vm4240_vm5, %v7744_v21, 0.0 }
 0x2c0   :  { %4374 = vadd.xlane.f32.xlu0 %v4373_v14 }
 0x2c7   :  { %v7750_v22 = vpop.eup %6721 }
 0x2c8   :  { %v7752_v15 = vpop.eup %6723  ;;  %v4382_v31 = vsel %vm4240_vm5, %v7750_v22, 0.0 }
 0x2c9   :  { %4383 = vadd.xlane.f32.xlu1 %v4382_v31  ;;  %v4379_v32 = vsel %vm4240_vm5, %v7752_v15, 0.0 }
 0x2ca   :  { %4380 = vadd.xlane.f32.xlu0 %v4379_v32 }
 0x2cb   :  { %v7758_v5 = vpop.eup %6725 }
 0x2cc   :  { %v7760_v8 = vpop.eup %6727  ;;  %v4358_v9 = vsel %vm4240_vm5, %v7758_v5, 0.0 }
 0x2cd   :  { %4359 = vadd.xlane.f32.xlu1 %v4358_v9  ;;  %v4355_v12 = vsel %vm4240_vm5, %v7760_v8, 0.0 }
 0x2ce   :  { %4356 = vadd.xlane.f32.xlu0 %v4355_v12 }
 0x30c   :  { %v4339_v13 = vpop.xlane.xlu0 %4338 }
 0x30d   :  { %6729 = vrcp.f32 %v4339_v13 }
 0x310   :  { %v4342_v16 = vpop.xlane.xlu1 %4341 }
 0x316   :  { %v4348_v18 = vpop.xlane.xlu1 %4347 }
 0x317   :  { %v4345_v17 = vpop.xlane.xlu0 %4344 }
 0x31a   :  { %v6730_v41 = vpop.eup %6729 }
 0x31b   :  { %v4401_v50 = vmul.f32 %v6730_v41, %v7678_v48 }
 0x320   :  { %v4354_v27 = vpop.xlane.xlu1 %4353 }
 0x321   :  { %v4351_v23 = vpop.xlane.xlu0 %4350 }
 0x334   :  { %v4363_v35 = vpop.xlane.xlu0 %4362 }
 0x335   :  { %6731 = vrcp.f32 %v4363_v35 }
 0x336   :  { %6733 = vrcp.f32 %v4342_v16 }
 0x338   :  { %v4366_v36 = vpop.xlane.xlu1 %4365 }
 0x339   :  { %6735 = vrcp.f32 %v4366_v36 }
 0x33a   :  { %6737 = vrcp.f32 %v4348_v18 }
 0x33b   :  { %6739 = vrcp.f32 %v4345_v17 }
 0x33e   :  { %v4372_v39 = vpop.xlane.xlu1 %4371 }
 0x33f   :  { %6741 = vrcp.f32 %v4372_v39  ;;  %v4369_v40 = vpop.xlane.xlu0 %4368 }
 0x340   :  { %6743 = vrcp.f32 %v4369_v40 }
 0x341   :  { %6745 = vrcp.f32 %v4354_v27 }
 0x342   :  { %v6732_v46 = vpop.eup %6731  ;;  %6747 = vrcp.f32 %v4351_v23 }
 0x343   :  { %v4409_v25 = vmul.f32 %v6732_v46, %v7714_v26  ;;  %v6734_v28 = vpop.eup %6733 }
 0x344   :  { %v4402_v0 = vmul.f32 %v6734_v28, %v7686_v60 }
 0x345   :  { %v4419_v52 = vmul.f32 %v7769_v24, %v4409_v25 }
 0x346   :  { %v6736_v42 = vpop.eup %6735 }
 0x347   :  { %v4410_v44 = vmul.f32 %v6736_v42, %v7722_v43  ;;  %v4427_v45 = vsub.f32 %v4401_v50, %v4419_v52  ;;  %v6738_v63 = vpop.eup %6737 }
 0x348   :  { %v4378_v53 = vpop.xlane.xlu1 %4377  ;;  %v6740_v48 = vpop.eup %6739 }
 0x349   :  { %6749 = vrcp.f32 %v4378_v53  ;;  %v4375_v58 = vpop.xlane.xlu0 %4374  ;;  %6615 = vmatmul.mubr.msk.f32.vlgmr.msra.gmra.mxu0 %vm4240_vm5, %v4427_v45  ;;  %v4420_v26 = vmul.f32 %v7769_v24, %v4410_v44  ;;  %v4403_v47 = vmul.f32 %v6740_v48, %v7692_v7 }
 0x34a   :  { %6751 = vrcp.f32 %v4375_v58  ;;  %6623 = vmatpush3.msra.mxu0 %v7562_v29  ;;  %6624 = vmatprep.mubr.msk.f32.mxu0 %vm6800_vm1, %v6799_v1  ;;  %v4404_v29 = vmul.f32 %v6738_v63, %v7690_v6 }
 0x34b   :  { %v4428_v43 = vsub.f32 %v4402_v0, %v4420_v26  ;;  %6632 = vmatprep.subr.mxu0 %v6799_v1 }
 0x34c   :  { %v6742_v2 = vpop.eup %6741 }
 0x34d   :  { %v6744_v56 = vpop.eup %6743  ;;  %v4412_v57 = vmul.f32 %v6742_v2, %v7726_v54  ;;  %6620 = vmatmul.mubr.msk.f32.vlgmr.msra.gmra.mxu1 %vm4240_vm5, %v4428_v43 }
 0x34e   :  { %v4411_v60 = vmul.f32 %v6744_v56, %v7728_v55  ;;  %6628 = vmatpush3.msra.mxu1 %v7564_v30  ;;  %6629 = vmatprep.mubr.msk.f32.mxu1 %vm6800_vm1, %v6799_v1  ;;  %v6746_v30 = vpop.eup %6745 }
 0x34f   :  { %6637 = vmatprep.subr.mxu1 %v6799_v1  ;;  %v4422_v3 = vmul.f32 %v7769_v24, %v4412_v57  ;;  %v6748_v6 = vpop.eup %6747 }
 0x350   :  { %v4421_v49 = vmul.f32 %v7769_v24, %v4411_v60  ;;  %v4405_v31 = vmul.f32 %v6748_v6, %v7700_v11 }
 0x351   :  { %v4430_v54 = vsub.f32 %v4404_v29, %v4422_v3 }
 0x352   :  { %v4384_v51 = vpop.xlane.xlu1 %4383  ;;  %v4429_v4 = vsub.f32 %v4403_v47, %v4421_v49  ;;  %v120_v49 = vld [vmem:[%s7950_s7] sm:$0xff] }
 0x353   :  { %6753 = vrcp.f32 %v4384_v51  ;;  %v4381_v55 = vpop.xlane.xlu0 %4380  ;;  %6630 = vmatmul.mubr.msk.f32.vlgmr.msra.gmra.mxu1 %vm4240_vm5, %v4430_v54 }
 0x354   :  { %6755 = vrcp.f32 %v4381_v55  ;;  %6625 = vmatmul.mubr.msk.f32.vlgmr.msra.gmra.mxu0 %vm4240_vm5, %v4429_v4  ;;  %6638 = vmatpush3.msra.mxu1 %v7568_v34 }
 0x355   :  { %6633 = vmatpush3.msra.mxu0 %v7566_v33  ;;  %6634 = vmatprep.mubr.msk.f32.mxu0 %vm6800_vm1, %v6799_v1  ;;  %v4406_v33 = vmul.f32 %v6746_v30, %v7698_v10 }
 0x356   :  { %v6750_v7 = vpop.eup %6749  ;;  %v4360_v59 = vpop.xlane.xlu1 %4359  ;;  %6639 = vmatprep.mubr.msk.f32.mxu1 %vm6800_vm1, %v6799_v1  ;;  %6642 = vmatprep.subr.mxu0 %v6799_v1 }
 0x357   :  { %v6752_v61 = vpop.eup %6751  ;;  %v4414_v62 = vmul.f32 %v6750_v7, %v7742_v19  ;;  %6757 = vrcp.f32 %v4360_v59  ;;  %v4357_v20 = vpop.xlane.xlu0 %4356  ;;  %6647 = vmatprep.subr.mxu1 %v6799_v1 }
 0x358   :  { %v4413_v34 = vmul.f32 %v6752_v61, %v7744_v21  ;;  %6759 = vrcp.f32 %v4357_v20 }
 0x359   :  { %v4424_v14 = vmul.f32 %v7769_v24, %v4414_v62 }
 0x35a   :  { %v4423_v32 = vmul.f32 %v7769_v24, %v4413_v34 }
 0x35b   :  { %v4432_v9 = vsub.f32 %v4406_v33, %v4424_v14  ;;  %v7879_v14 = vld [vmem:[%s7951_s8] ss:$0 sm:$0xff] }
 0x35c   :  { %v4431_v12 = vsub.f32 %v4405_v31, %v4423_v32 }
 0x35d   :  { %6640 = vmatmul.mubr.msk.f32.vlgmr.msra.gmra.mxu1 %vm4240_vm5, %v4432_v9 }
 0x35e   :  { %6635 = vmatmul.mubr.msk.f32.vlgmr.msra.gmra.mxu0 %vm4240_vm5, %v4431_v12  ;;  %6648 = vmatpush3.msra.mxu1 %v7572_v38 }
 0x35f   :  { %6643 = vmatpush3.msra.mxu0 %v7570_v37  ;;  %6644 = vmatprep.mubr.msk.f32.mxu0 %vm6800_vm1, %v6799_v1 }
 0x360   :  { %v6754_v10 = vpop.eup %6753  ;;  %6649 = vmatprep.mubr.msk.f32.mxu1 %vm6800_vm1, %v6799_v1  ;;  %6652 = vmatprep.subr.mxu0 %v6799_v1 }
 0x361   :  { %v6756_v11 = vpop.eup %6755  ;;  %v4416_v19 = vmul.f32 %v6754_v10, %v7750_v22  ;;  %6657 = vmatprep.subr.mxu1 %v6799_v1 }
 0x362   :  { %v4415_v21 = vmul.f32 %v6756_v11, %v7752_v15 }
 0x363   :  { %v4426_v16 = vmul.f32 %v7769_v24, %v4416_v19 }
 0x364   :  { %v6758_v13 = vpop.eup %6757  ;;  %v4425_v18 = vmul.f32 %v7769_v24, %v4415_v21 }
 0x365   :  { %v6760_v38 = vpop.eup %6759  ;;  %v4408_v37 = vmul.f32 %v6758_v13, %v7758_v5 }
 0x366   :  { %v4407_v17 = vmul.f32 %v6760_v38, %v7760_v8 }
 0x367   :  { %v4434_v23 = vsub.f32 %v4408_v37, %v4426_v16  ;;  %v121_v37 = vld [vmem:[%s7950_s7 + $0x8] sm:$0xff] }
 0x368   :  { %v4433_v27 = vsub.f32 %v4407_v17, %v4425_v18 }
 0x369   :  { %6650 = vmatmul.mubr.msk.f32.vlgmr.msra.gmra.mxu1 %vm4240_vm5, %v4434_v23 }
 0x36a   :  { %6645 = vmatmul.mubr.msk.f32.vlgmr.msra.gmra.mxu0 %vm4240_vm5, %v4433_v27  ;;  %6659 = vmatprep.mubr.msk.f32.mxu1 %vm6800_vm1, %v6799_v1 }
 0x36b   :  { %6654 = vmatprep.mubr.msk.f32.mxu0 %vm6800_vm1, %v6799_v1  ;;  %6653 = vmatpush3.msra.mxu0 %v120_v49 }
 0x36c   :  { %6658 = vmatpush3.msra.mxu1 %v120_v49  ;;  %6662 = vmatprep.subr.mxu0 %v6799_v1 }
 0x36d   :  { %6667 = vmatprep.subr.mxu1 %v6799_v1 }
 0x409   :  { %v7831_v22 = vpop.f32.mrf.mxu0 }
 0x40a   :  { %v5019_v15 = vmul.f32 %v7831_v22, %v7831_v22 }
 0x40b   :  { %v6616_v5 = vpop.f32.mrf.mxu0 }
 0x40c   :  { %v5027_v8 = vsel %vm4240_vm5, %v5019_v15, 0.0 }
 0x40d   :  { %v7836_v35 = vpop.f32.mrf.mxu1  ;;  %5028 = vadd.xlane.f32.xlu0 %v5027_v8 }
 0x40e   :  { %v5020_v36 = vmul.f32 %v7836_v35, %v7836_v35 }
 0x40f   :  { %v6621_v39 = vpop.f32.mrf.mxu1 }
 0x410   :  { %v5030_v40 = vsel %vm4240_vm5, %v5020_v36, 0.0 }
 0x411   :  { %5031 = vadd.xlane.f32.xlu1 %v5030_v40 }
 0x413   :  { %v7841_v41 = vpop.f32.mrf.mxu1 }
 0x414   :  { %v7843_v46 = vpop.f32.mrf.mxu0  ;;  %v5022_v24 = vmul.f32 %v7841_v41, %v7841_v41 }
 0x415   :  { %v5021_v25 = vmul.f32 %v7843_v46, %v7843_v46  ;;  %v6631_v28 = vpop.f32.mrf.mxu1 }
 0x416   :  { %v6626_v50 = vpop.f32.mrf.mxu0  ;;  %v5036_v52 = vsel %vm4240_vm5, %v5022_v24, 0.0 }
 0x417   :  { %5037 = vadd.xlane.f32.xlu1 %v5036_v52  ;;  %v5033_v42 = vsel %vm4240_vm5, %v5021_v25, 0.0 }
 0x418   :  { %5034 = vadd.xlane.f32.xlu0 %v5033_v42 }
 0x41d   :  { %v7851_v44 = vpop.f32.mrf.mxu1 }
 0x41e   :  { %v7853_v45 = vpop.f32.mrf.mxu0  ;;  %v5024_v53 = vmul.f32 %v7851_v44, %v7851_v44 }
 0x41f   :  { %v5023_v58 = vmul.f32 %v7853_v45, %v7853_v45  ;;  %v6641_v0 = vpop.f32.mrf.mxu1 }
 0x420   :  { %v6636_v26 = vpop.f32.mrf.mxu0  ;;  %v5042_v63 = vsel %vm4240_vm5, %v5024_v53, 0.0 }
 0x421   :  { %5043 = vadd.xlane.f32.xlu1 %v5042_v63  ;;  %v5039_v48 = vsel %vm4240_vm5, %v5023_v58, 0.0  ;;  %v123_v63 = vld [vmem:[%s7950_s7 + $0x18] sm:$0xff] }
 0x422   :  { %5040 = vadd.xlane.f32.xlu0 %v5039_v48 }
 0x429   :  { %v7861_v43 = vpop.f32.mrf.mxu1 }
 0x42a   :  { %v7863_v2 = vpop.f32.mrf.mxu0  ;;  %v5026_v56 = vmul.f32 %v7861_v43, %v7861_v43 }
 0x42b   :  { %v5025_v57 = vmul.f32 %v7863_v2, %v7863_v2  ;;  %v6651_v60 = vpop.f32.mrf.mxu1 }
 0x42c   :  { %v6646_v29 = vpop.f32.mrf.mxu0  ;;  %v5048_v3 = vsel %vm4240_vm5, %v5026_v56, 0.0 }
 0x42d   :  { %5049 = vadd.xlane.f32.xlu1 %v5048_v3  ;;  %v5045_v47 = vsel %vm4240_vm5, %v5025_v57, 0.0 }
 0x42e   :  { %5046 = vadd.xlane.f32.xlu0 %v5045_v47 }
 0x496   :  { %v5029_v54 = vpop.xlane.xlu0 %5028 }
 0x497   :  { %v5052_v51 = vmul.f32 0.125, %v5029_v54 }
 0x499   :  { %v5060_v4 = vadd.f32 1e-05, %v5052_v51 }
 0x49a   :  { %v5032_v55 = vpop.xlane.xlu1 %5031 }
 0x49b   :  { %6761 = vrsqrt.f32 %v5060_v4  ;;  %v5053_v30 = vmul.f32 0.125, %v5032_v55 }
 0x49d   :  { %v5061_v6 = vadd.f32 1e-05, %v5053_v30 }
 0x49f   :  { %6763 = vrsqrt.f32 %v5061_v6 }
 0x4a0   :  { %v5038_v7 = vpop.xlane.xlu1 %5037 }
 0x4a1   :  { %v5055_v59 = vmul.f32 0.125, %v5038_v7  ;;  %v5035_v61 = vpop.xlane.xlu0 %5034 }
 0x4a2   :  { %v5054_v62 = vmul.f32 0.125, %v5035_v61 }
 0x4a3   :  { %v5063_v20 = vadd.f32 1e-05, %v5055_v59 }
 0x4a4   :  { %v5062_v34 = vadd.f32 1e-05, %v5054_v62 }
 0x4a5   :  { %6765 = vrsqrt.f32 %v5063_v20 }
 0x4a6   :  { %6767 = vrsqrt.f32 %v5062_v34 }
 0x4a8   :  { %v6762_v33 = vpop.eup %6761 }
 0x4a9   :  { %v5076_v31 = vmul.f32 %v6762_v33, %v7831_v22 }
 0x4aa   :  { %v5044_v32 = vpop.xlane.xlu1 %5043 }
 0x4ab   :  { %v5057_v9 = vmul.f32 0.125, %v5044_v32  ;;  %v5041_v12 = vpop.xlane.xlu0 %5040  ;;  %v5091_v10 = vmul.f32 %v7879_v14, %v5076_v31 }
 0x4ac   :  { %v6764_v11 = vpop.eup %6763  ;;  %v5056_v19 = vmul.f32 0.125, %v5041_v12 }
 0x4ad   :  { %v5065_v21 = vadd.f32 1e-05, %v5057_v9  ;;  %v5099_v13 = vmul.f32 0.529287, %v5091_v10  ;;  %v5077_v38 = vmul.f32 %v6764_v11, %v7836_v35 }
 0x4ae   :  { %v5064_v16 = vadd.f32 1e-05, %v5056_v19 }
 0x4af   :  { %6769 = vrsqrt.f32 %v5065_v21  ;;  %6655 = vmatmul.mubr.msk.f32.vlgmr.msra.gmra.mxu0 %vm4240_vm5, %v5099_v13  ;;  %v5092_v17 = vmul.f32 %v7879_v14, %v5077_v38 }
 0x4b0   :  { %6771 = vrsqrt.f32 %v5064_v16  ;;  %6663 = vmatpush3.msra.mxu0 %v121_v37  ;;  %6664 = vmatprep.mubr.msk.f32.mxu0 %vm6800_vm1, %v6799_v1 }
 0x4b1   :  { %v5100_v18 = vmul.f32 0.529287, %v5092_v17  ;;  %6672 = vmatprep.subr.mxu0 %v6799_v1 }
 0x4b2   :  { %v6766_v23 = vpop.eup %6765 }
 0x4b3   :  { %v6768_v27 = vpop.eup %6767  ;;  %6660 = vmatmul.mubr.msk.f32.vlgmr.msra.gmra.mxu1 %vm4240_vm5, %v5100_v18  ;;  %v5079_v22 = vmul.f32 %v6766_v23, %v7841_v41  ;;  %v122_v41 = vld [vmem:[%s7950_s7 + $0x10] sm:$0xff]  ;;  %s6801_s7 = smov [#allocation3]  }
 0x4b4   :  { %6668 = vmatpush3.msra.mxu1 %v121_v37  ;;  %6669 = vmatprep.mubr.msk.f32.mxu1 %vm6800_vm1, %v6799_v1  ;;  %v5078_v15 = vmul.f32 %v6768_v27, %v7843_v46  ;;  %s5712_s1 = sshll.u32 %s6801_s7, 4  ;;  %s5713_s1 = int_to_ptr.vmem [resolvable:$true] %s5712_s1 }
 0x4b5   :  { %v5094_v5 = vmul.f32 %v7879_v14, %v5079_v22  ;;  %6677 = vmatprep.subr.mxu1 %v6799_v1  ;;  %s6777_s2 = scalar_lea.vmem %s5713_s1, 256  ;;  %p6782_p1 = scmp.lt.s32.totalorder %s5713_s1, %s5713_s1 }
 0x4b6   :  { %v5050_v8 = vpop.xlane.xlu1 %5049  ;;  %v5093_v35 = vmul.f32 %v7879_v14, %v5078_v15  ;;  %p6778_p0 = scmp.ne.s32.totalorder %s5713_s1, %s6777_s2  ;;  %p6783_p2 = scmp.lt.s32.totalorder %s6777_s2, %s6777_s2 }
 0x4b7   :  { %v5059_v36 = vmul.f32 0.125, %v5050_v8  ;;  %v5047_v39 = vpop.xlane.xlu0 %5046  ;;  %v5102_v40 = vmul.f32 0.529287, %v5094_v5 }
 0x4b8   :  { %v5058_v24 = vmul.f32 0.125, %v5047_v39  ;;  %v5101_v25 = vmul.f32 0.529287, %v5093_v35  ;;  %p6784_p3 = por %p6783_p2, %p6782_p1 }
 0x4b9   :  { %v5067_v28 = vadd.f32 1e-05, %v5059_v36  ;;  %6670 = vmatmul.mubr.msk.f32.vlgmr.msra.gmra.mxu1 %vm4240_vm5, %v5102_v40 }
 0x4ba   :  { %v5066_v46 = vadd.f32 1e-05, %v5058_v24  ;;  %6665 = vmatmul.mubr.msk.f32.vlgmr.msra.gmra.mxu0 %vm4240_vm5, %v5101_v25  ;;  %6678 = vmatpush3.msra.mxu1 %v122_v41  ;;  %p6785_p4 = pnand %p6784_p3, %p6778_p0 }
 0x4bb   :  { %6773 = vrsqrt.f32 %v5067_v28  ;;  %6673 = vmatpush3.msra.mxu0 %v122_v41  ;;  %6674 = vmatprep.mubr.msk.f32.mxu0 %vm6800_vm1, %v6799_v1 }
 0x4bc   :  { %v6770_v50 = vpop.eup %6769  ;;  %6775 = vrsqrt.f32 %v5066_v46  ;;  %6679 = vmatprep.mubr.msk.f32.mxu1 %vm6800_vm1, %v6799_v1  ;;  %6682 = vmatprep.subr.mxu0 %v6799_v1 }
 0x4bd   :  { %v6772_v52 = vpop.eup %6771  ;;  %v5081_v42 = vmul.f32 %v6770_v50, %v7851_v44  ;;  %6687 = vmatprep.subr.mxu1 %v6799_v1 }
 0x4be   :  { %v5080_v53 = vmul.f32 %v6772_v52, %v7853_v45 }
 0x4bf   :  { %v5096_v58 = vmul.f32 %v7879_v14, %v5081_v42 }
 0x4c0   :  { %v5095_v0 = vmul.f32 %v7879_v14, %v5080_v53 }
 0x4c1   :  { %v5104_v26 = vmul.f32 0.529287, %v5096_v58 }
 0x4c2   :  { %v5103_v48 = vmul.f32 0.529287, %v5095_v0 }
 0x4c3   :  { %6680 = vmatmul.mubr.msk.f32.vlgmr.msra.gmra.mxu1 %vm4240_vm5, %v5104_v26 }
 0x4c4   :  { %6675 = vmatmul.mubr.msk.f32.vlgmr.msra.gmra.mxu0 %vm4240_vm5, %v5103_v48  ;;  %6688 = vmatpush3.msra.mxu1 %v123_v63 }
 0x4c5   :  { %6683 = vmatpush3.msra.mxu0 %v123_v63  ;;  %6684 = vmatprep.mubr.msk.f32.mxu0 %vm6800_vm1, %v6799_v1 }
 0x4c6   :  { %6689 = vmatprep.mubr.msk.f32.mxu1 %vm6800_vm1, %v6799_v1 }
 0x4c8   :  { %v6774_v44 = vpop.eup %6773 }
 0x4c9   :  { %v6776_v45 = vpop.eup %6775  ;;  %v5083_v56 = vmul.f32 %v6774_v44, %v7861_v43 }
 0x4ca   :  { %v5082_v57 = vmul.f32 %v6776_v45, %v7863_v2 }
 0x4cb   :  { %v5098_v60 = vmul.f32 %v7879_v14, %v5083_v56 }
 0x4cc   :  { %v5097_v29 = vmul.f32 %v7879_v14, %v5082_v57 }
 0x4cd   :  { %v5106_v3 = vmul.f32 0.529287, %v5098_v60 }
 0x4ce   :  { %v5105_v47 = vmul.f32 0.529287, %v5097_v29 }
 0x4cf   :  { %6690 = vmatmul.mubr.msk.f32.vlgmr.msra.gmra.mxu1 %vm4240_vm5, %v5106_v3 }
 0x4d0   :  { %6685 = vmatmul.mubr.msk.f32.vlgmr.msra.gmra.mxu0 %vm4240_vm5, %v5105_v47 }
 0x56f   :  { %v5176_v49 = vpop.f32.mrf.mxu0 }
 0x570   :  { %v5691_v33 = vsel %vm124_vm0, %v5176_v49, 0.0 }
 0x571   :  { %v6656_v54 = vpop.f32.mrf.mxu0 }
 0x573   :  { %v5249_v51 = vpop.f32.mrf.mxu1 }
 0x574   :  { %v5698_v20 = vsel %vm124_vm0, %v5249_v51, 0.0 }
 0x575   :  { %v6661_v1 = vpop.f32.mrf.mxu1 }
 0x579   :  { %v5395_v4 = vpop.f32.mrf.mxu1 }
 0x57a   :  { %v5322_v55 = vpop.f32.mrf.mxu0  ;;  %v5699_v61 = vsel %vm124_vm0, %v5395_v4, 0.0 }
 0x57b   :  { %v6671_v30 = vpop.f32.mrf.mxu1  ;;  %v5692_v62 = vsel %vm124_vm0, %v5322_v55, 0.0  ;;  %v5700_v14 = vadd.f32 %v5699_v61, %v5698_v20 }
 0x57c   :  { %v6666_v43 = vpop.f32.mrf.mxu0  ;;  %v5693_v32 = vadd.f32 %v5692_v62, %v5691_v33 }
 0x583   :  { %v5541_v6 = vpop.f32.mrf.mxu1 }
 0x584   :  { %v5468_v2 = vpop.f32.mrf.mxu0  ;;  %v5701_v34 = vsel %vm124_vm0, %v5541_v6, 0.0 }
 0x585   :  { %v6681_v7 = vpop.f32.mrf.mxu1  ;;  %v5694_v31 = vsel %vm124_vm0, %v5468_v2, 0.0  ;;  %v5702_v9 = vadd.f32 %v5701_v34, %v5700_v14 }
 0x586   :  { %v6676_v59 = vpop.f32.mrf.mxu0  ;;  %v5695_v10 = vadd.f32 %v5694_v31, %v5693_v32 }
 0x58f   :  { %v5687_v12 = vpop.f32.mrf.mxu1 }
 0x590   :  { %v5614_v11 = vpop.f32.mrf.mxu0  ;;  %v5703_v19 = vsel %vm124_vm0, %v5687_v12, 0.0 }
 0x591   :  { %v5696_v21 = vsel %vm124_vm0, %v5614_v11, 0.0  ;;  %v5704_v13 = vadd.f32 %v5703_v19, %v5702_v9  ;;  %v6691_v38 = vpop.f32.mrf.mxu1 }
 0x592   :  { %v5697_v37 = vadd.f32 %v5696_v21, %v5695_v10  ;;  %v6686_v16 = vpop.f32.mrf.mxu0 }
 0x593   :  { %5706 = vst.msk [vmem:[#allocation3 + $0x8] sm:$0xff] %vm124_vm0, %v5704_v13 }
 0x594   :  { %5705 = vst.msk [vmem:[#allocation3] sm:$0xff] %vm124_vm0, %v5697_v37 }
 0x595   :  { %6788 = shalt.err (!%p6785_p4)
}
 0x596   :  { %s6802_s23 = smov 128   ;;  %s6803_s24 = smov 8  }
 0x597   :  { %5718 = dma.vmem_to_hbm [thread:$0]  %s5713_s1, 256, %s7952_s9, [#allocation4], %s6802_s23, %s6802_s23, %s6803_s24  }
 0x598   :  { %6797 = dma.done.wait [#allocation4], 256  }
 0x599   :  { %6798 = vsyncadd [#allocation4], 4294967040 }
 0x59a   :  { %5722 = vsyncpa [#allocation4], 1 }

</bundles_post_ra>
